<compile_context>
chip_gen: v7x
topology: tpu7x:2x2x1
jax: 0.10.0
libtpu: 0.0.40
codegen_flags: <defaults>
</compile_context>

<pallas_src>
import jax
import jax.numpy as jnp
from jax import lax
from jax.experimental import pallas as pl
from jax.experimental.pallas import tpu as pltpu


def _rope_kernel(inv_freq_ref, cos_ref, sin_ref):
    blk_seq, dim = cos_ref.shape
    half = dim // 2

    # Global position of each row in this block.  Column iota only: (blk_seq, 1)
    # int32, add row offset, convert to f32.  Exact up to 2^24 positions (f32
    # integer exactness limit) -- far beyond realistic sequence lengths.
    row0 = pl.program_id(0) * blk_seq
    t_col = (lax.broadcasted_iota(jnp.int32, (blk_seq, 1), 0) + row0).astype(jnp.float32)

    # freqs = outer(t, inv_freq): (blk_seq, 1) * (1, half) -> (blk_seq, half).
    freqs = t_col * inv_freq_ref[...]

    # VPU polynomial trig on the half width only; the two halves of emb are
    # identical, so this halves the dominant VALU work.
    cos_h = jnp.cos(freqs)
    sin_h = jnp.sin(freqs)

    if half >= 128:
        # Halves are already lane-dense (>= 128 lanes, multiple of 128 here):
        # direct unmasked slice stores, no concat temporary.
        cos_ref[:, :half] = cos_h
        cos_ref[:, half:] = cos_h
        sin_ref[:, :half] = sin_h
        sin_ref[:, half:] = sin_h
    elif dim >= 128:
        # 128 <= dim < 256: the concatenated full-width result is lane-dense
        # while the halves would be sub-128 masked stores -> concat wins.
        cos_ref[...] = jnp.concatenate([cos_h, cos_h], axis=-1)
        sin_ref[...] = jnp.concatenate([sin_h, sin_h], axis=-1)
    else:
        # Narrow dim: everything is masked anyway; skip the XLU concat.
        cos_ref[:, :half] = cos_h
        cos_ref[:, half:] = cos_h
        sin_ref[:, :half] = sin_h
        sin_ref[:, half:] = sin_h


def _round_up_8(v):
    return ((v + 7) // 8) * 8


def rotary_embedding(x, inv_freq, *, blk_seq=1024):
    """x: [batch, seq, dim_any]; inv_freq: [dim//2] float32.
    Returns (cos, sin), each [seq, dim] float32."""
    seq_len = x.shape[1]
    half = inv_freq.shape[0]
    dim = 2 * half

    # Seq tile: large (default 1024 rows) to amortize the ~0.35 us per-step
    # pipeline overhead, clamped to the (8-aligned) sequence length.
    seq_rounded = _round_up_8(seq_len)
    blk_seq = max(8, min(_round_up_8(blk_seq), seq_rounded))
    # Keep at least 2 grid steps when the sequence allows it so the "parallel"
    # axis can shard across both TensorCores on v7x (neutral on v5e/v6e).
    if seq_rounded >= 16:
        blk_seq = min(blk_seq, max(8, _round_up_8(pl.cdiv(seq_rounded, 2))))
    padded_seq = pl.cdiv(seq_len, blk_seq) * blk_seq
    grid = (padded_seq // blk_seq,)

    inv_freq_2d = inv_freq.reshape(1, half).astype(jnp.float32)

    # Advisory scheduler hint: write-heavy table generation.
    cost = pl.CostEstimate(
        flops=2 * padded_seq * half,
        transcendentals=2 * padded_seq * half,       # one cos + one sin per half-elem
        bytes_accessed=2 * padded_seq * dim * 4 + half * 4,
    )

    cos, sin = pl.pallas_call(
        _rope_kernel,
        out_shape=(
            jax.ShapeDtypeStruct((padded_seq, dim), jnp.float32),
            jax.ShapeDtypeStruct((padded_seq, dim), jnp.float32),
        ),
        grid=grid,
        in_specs=[pl.BlockSpec((1, half), lambda i: (0, 0))],   # resident, no re-DMA
        out_specs=(
            pl.BlockSpec((blk_seq, dim), lambda i: (i, 0)),
            pl.BlockSpec((blk_seq, dim), lambda i: (i, 0)),
        ),
        compiler_params=pltpu.CompilerParams(
            dimension_semantics=("parallel",)),
        cost_estimate=cost,
    )(inv_freq_2d)

    if padded_seq != seq_len:
        cos = cos[:seq_len]
        sin = sin[:seq_len]
    return cos, sin


def rotary_embedding_ref(x, inv_freq):
    seq_len = x.shape[1]
    t = jnp.arange(seq_len, dtype=inv_freq.dtype)
    freqs = jnp.einsum("i,j->ij", t, inv_freq)
    emb = jnp.concatenate([freqs, freqs], axis=-1)
    return jnp.cos(emb), jnp.sin(emb)


if __name__ == "__main__":
    # Shapes consistent with the module spec: dim=512, seq_len=100, small batch.
    dim = 512
    seq = 100
    batch = 2

    # Deterministic parameter init per __init__: inv_freq = 1 / base^(arange(0,dim,2)/dim)
    base = 10000.0
    inv_freq = 1.0 / (base ** (jnp.arange(0, dim, 2, dtype=jnp.float32) / dim))

    key = jax.random.PRNGKey(0)
    x = jax.random.normal(key, (batch, seq, dim), dtype=jnp.float32)

    cos, sin = rotary_embedding(x, inv_freq)
    cos, sin = jax.block_until_ready((cos, sin))

    cos_ref, sin_ref = rotary_embedding_ref(x, inv_freq)
    assert cos.shape == (seq, dim) and sin.shape == (seq, dim)
    assert jnp.allclose(cos, cos_ref, atol=1e-5, rtol=1e-5)
    assert jnp.allclose(sin, sin_ref, atol=1e-5, rtol=1e-5)

    print("KERNEL_OK")
</pallas_src>

<mosaic_0001>
module attributes {stable_mosaic.version = 11 : i64} {
  func.func @_rope_kernel(%arg0: i32, %arg1: memref<1x256xf32, #tpu.memory_space<vmem>>, %arg2: memref<56x512xf32, #tpu.memory_space<vmem>>, %arg3: memref<56x512xf32, #tpu.memory_space<vmem>>) attributes {dimension_semantics = [#tpu.dimension_semantics<parallel>], iteration_bounds = array<i64: 2>, scalar_prefetch = 0 : i64, scratch_operands = 0 : i64, tpu.core_type = #tpu.core_type<tc>, window_params = [{pipeline_mode = #tpu.pipeline_mode<synchronous>, transform_indices = @transform_0, window_bounds = array<i64: 1, 256>}, {transform_indices = @transform_1, window_bounds = array<i64: 56, 512>}, {transform_indices = @transform_2, window_bounds = array<i64: 56, 512>}]} {
    %c56_i32 = arith.constant 56 : i32
    %0 = arith.muli %arg0, %c56_i32 : i32
    %1 = tpu.iota {dimensions = array<i32: 0>} : vector<56x1xi32>
    %2 = vector.broadcast %0 : i32 to vector<56x1xi32>
    %3 = arith.addi %1, %2 : vector<56x1xi32>
    %4 = arith.sitofp %3 : vector<56x1xi32> to vector<56x1xf32>
    %c0 = arith.constant 0 : index
    %c0_0 = arith.constant 0 : index
    %5 = vector.load %arg1[%c0, %c0_0] : memref<1x256xf32, #tpu.memory_space<vmem>>, vector<1x256xf32>
    %6 = vector.broadcast %4 : vector<56x1xf32> to vector<56x256xf32>
    %7 = vector.broadcast %5 : vector<1x256xf32> to vector<56x256xf32>
    %8 = arith.mulf %6, %7 : vector<56x256xf32>
    %9 = math.cos %8 : vector<56x256xf32>
    %10 = math.sin %8 : vector<56x256xf32>
    %c0_1 = arith.constant 0 : index
    %c0_2 = arith.constant 0 : index
    %11 = vector.load %arg2[%c0_1, %c0_2] : memref<56x512xf32, #tpu.memory_space<vmem>>, vector<56x256xf32>
    tpu.vector_store %arg2[%c0_1, %c0_2], %9 {strides = array<i32>} : memref<56x512xf32, #tpu.memory_space<vmem>>, vector<56x256xf32>,
    %c0_3 = arith.constant 0 : index
    %c256 = arith.constant 256 : index
    %12 = vector.load %arg2[%c0_3, %c256] : memref<56x512xf32, #tpu.memory_space<vmem>>, vector<56x256xf32>
    tpu.vector_store %arg2[%c0_3, %c256], %9 {strides = array<i32>} : memref<56x512xf32, #tpu.memory_space<vmem>>, vector<56x256xf32>,
    %c0_4 = arith.constant 0 : index
    %c0_5 = arith.constant 0 : index
    %13 = vector.load %arg3[%c0_4, %c0_5] : memref<56x512xf32, #tpu.memory_space<vmem>>, vector<56x256xf32>
    tpu.vector_store %arg3[%c0_4, %c0_5], %10 {strides = array<i32>} : memref<56x512xf32, #tpu.memory_space<vmem>>, vector<56x256xf32>,
    %c0_6 = arith.constant 0 : index
    %c256_7 = arith.constant 256 : index
    %14 = vector.load %arg3[%c0_6, %c256_7] : memref<56x512xf32, #tpu.memory_space<vmem>>, vector<56x256xf32>
    tpu.vector_store %arg3[%c0_6, %c256_7], %10 {strides = array<i32>} : memref<56x512xf32, #tpu.memory_space<vmem>>, vector<56x256xf32>,
    return
  }
  func.func @transform_0(%arg0: i32) -> (i32, i32) {
    %c0_i32 = arith.constant 0 : i32
    %c0_i32_0 = arith.constant 0 : i32
    %c0_i32_1 = arith.constant 0 : i32
    return %c0_i32, %c0_i32_0 : i32, i32
  }
  func.func @transform_1(%arg0: i32) -> (i32, i32) {
    %c0_i32 = arith.constant 0 : i32
    %c0_i32_0 = arith.constant 0 : i32
    return %arg0, %c0_i32 : i32, i32
  }
  func.func @transform_2(%arg0: i32) -> (i32, i32) {
    %c0_i32 = arith.constant 0 : i32
    %c0_i32_0 = arith.constant 0 : i32
    return %arg0, %c0_i32 : i32, i32
  }
}

</mosaic_0001>

<bundles_post_ra>
// kernel: tpu_custom_call.1
= control target key start
LH: loop header
LB: loop body
LE: loop exit
PB: predicated region body
PF: predicated region fallthrough
CT: control target
= control target key end

     0   :  { %8 = vsyncpa [#allocation3], 0  ;;  %s5598_s0 = inlined_call_operand.hbm [shape: f32[1,256], index: 0, kind: input, shape index: {}]   ;;  %s5599_s1 = inlined_call_operand.hbm [shape: f32[112,512], index: 1, kind: output, shape index: {0}]   ;;  %s5600_s2 = inlined_call_operand.hbm [shape: f32[112,512], index: 2, kind: output, shape index: {1}]  }
   0x1   :  { %9 = vsyncpa [#allocation4], 0 }
   0x2   :  { %11 = vsyncpa [#allocation4 + $0x1], 0 }
   0x3   :  { %12 = vsyncpa [#allocation7], 0 }
   0x4   :  { %14 = vsyncpa [#allocation7 + $0x1], 0  ;;  %s3742_s9 = smov 0   ;;  %s3744_s10 = smov 0  }
   0x5   :  { %s3746_s11 = smov 0   ;;  %s3748_s12 = smov 0  }
   0x6 LB: > { %s3763_s13 = sadd.s32 4294967295, %s3714_s12   ;;  %s3283_s14 = sadd.s32 4294967294, %s3714_s12   ;;  %s3714_s12 = sphi %s3748_s12, %s5794_s12   ;;  %s3710_s11 = sphi %s3746_s11, %s5793_s11   ;;  %s3706_s10 = sphi %s3744_s10, %s5792_s10   ;;  %s3702_s9 = sphi %s3742_s9, %s5791_s9  }
   0x7   : > { %s3767_s15 = sadd.s32 1, %s3714_s12   ;;  %s48_s16 = sadd.s32 1, %s3710_s11 }
   0x8   : > { %s45_s17 = ssub.s32 %s3714_s12, %s3767_s15  ;;  %p58_p0 = scmp.ne.s32.totalorder %s3710_s11, %s3706_s10 }
   0x9   : > { %p46_p1 = scmp.eq.s32.totalorder %s45_s17, 0  ;;  %p59_p2 = scmp.eq.s32.totalorder %s3763_s13, 1 }
   0xa   : > { %p64_p3 = scmp.ne.s32.totalorder %s3706_s10, %s3702_s9  ;;  %p65_p4 = scmp.eq.s32.totalorder %s3283_s14, 1 }
   0xb   : > { %s3778_s18 = scalar_select %p46_p1, %s3710_s11, %s48_s16  }
   0xc   : > { %p3780_p5 = por %p59_p2, %p58_p0  ;;  %p3784_p6 = por %p65_p4, %p64_p3 }
   0xd   : > { %p3284_p7 = scmp.ge.s32.totalorder %s3714_s12, 1  ;;  %p98_p8 = scmp.lt.s32.totalorder %s3714_s12, 3 }
   0xe   : > { %s5674_s19 = scalar_select %p3780_p5, 1, 0 }
   0xf   : > { %s5675_s20 = scalar_select %p3784_p6, 1, 0 }
  0x10   : > { %p5601_p9 = scmp.eq.s32.totalorder %s3763_s13, 0  ;;  %p3791_p10 = pnand %p3284_p7, %p98_p8 }
  0x11   : > { %s3716_s22 = smov [#allocation2]   ;;  %s3588_s27 = scalar_lea.hbm %s5598_s0, 32 }
  0x12   : > { %s5676_s21 = scalar_select %p3791_p10, 1, 0 }
  0x13   : > { %s111_s23 = sshll.u32 %s3716_s22, 4  ;;  %p3477_p11 = pneg %p3791_p10  ;;  %s112_s23 = int_to_ptr.vmem [resolvable:$true] %s111_s23 }
  0x14   : > { %p3589_p13 = scmp.ne.s32.totalorder %s5598_s0, %s3588_s27  ;;  %p3595_p3 = scmp.lt.u32.totalorder %s3588_s27, %s5598_s0 }
  0x15   : > { %p3799_p12 = pnand %p5601_p9, %p3477_p11 }
  0x17   : > { %p3590_p0 = pneg %p3799_p12 }
  0x19   : > { %p3591_p1 = pnand %p3590_p0, %p3589_p13 }
  0x1b   : > { %p3592_p2 = pneg %p3591_p1 }
  0x1d   : > { %p3597_p4 = pnand %p3595_p3, %p3592_p2 }
  0x1f   : > { %3600 = shalt.err (!%p3597_p4)
}
  0x20   : > { %s3601_s4 = scalar_lea.vmem %s112_s23, 32  ;;  %p3609_p9 = scmp.lt.s32.totalorder %s112_s23, %s112_s23 }
  0x21   : > { %p3602_p7 = scmp.ne.s32.totalorder %s112_s23, %s3601_s4  ;;  %p3610_p6 = scmp.lt.s32.totalorder %s3601_s4, %s3601_s4 }
  0x23   : > { %p3604_p8 = pnand %p3602_p7, %p3590_p0  ;;  %p3611_p5 = por %p3610_p6, %p3609_p9 }
  0x25   : > { %p3605_p11 = pneg %p3604_p8 }
  0x27   : > { %p3612_p10 = pnand %p3611_p5, %p3605_p11 }
  0x29   : > { %3615 = shalt.err (!%p3612_p10)
}
  0x2a   : > { %3480 = dma.hbm_to_vmem [thread:$0]  (!%p3799_p12), %s5598_s0, 32, %s112_s23, [#allocation3]  }
  0x2b   : > { %p5678_p13 = scmp.ne.s32.totalorder %s5676_s21, 0 }
  0x2d   : > { %124 = sbr.rel (%p5678_p13) target bundleno = 503 (0x1f7), region = 24 }
  0x34   : > { %p5679_p1 = scmp.eq.s32.totalorder %s3763_s13, 0 }
  0x36   : > { %3689 = dma.done.wait (%p5679_p1), [#allocation3], 32   ;;  %p5680_p0 = pmov %p5679_p1 }
  0x37   : > { %s148_s7 = smul.u32 56, %s3763_s13  ;;  %v149_v0 = vlaneseq  ;;  %v172_v9 = vld [vmem:[#allocation2] sm:$0x3]  ;;  %v5655_v47 = vmov 683565275   ;;  %s4111_s8 = sand.u32 1, %s3706_s10  }
  0x38   : > { %3691 = vsyncadd (%p5680_p0), [#allocation3], 4294967264  ;;  %v5619_v49 = vmov 2475754826   ;;  %v5617_v51 = vmov 2131351028  }
  0x39   : > { %v3826_v1 = vshrl.u32 %v149_v0, 7  ;;  %v3828_v2 = vstv %s148_s7  ;;  %v5615_v53 = vmov 2102212464   ;;  %v5666_v55 = vmov 920167782   ;;  %s3412_s14 = smul.u32 224, %s4111_s8 }
  0x3a   : > { %v5624_v63 = vmov 1326507024   ;;  %s3410_s21 = smul.u32 3584, %s3763_s13  ;;  %s3153_s29 = scalar_lea.sflag [#allocation4], %s4111_s8 }
  0x3b   : > { %v158_v3 = vadd.s32 %v3828_v2, %v3826_v1  ;;  %v176_v4 = vsub.s32 0, %v3826_v1  ;;  %v180_v5 = vsub.s32 1, %v3826_v1  ;;  %v151_v6 = vadd.s32 8, %v3826_v1  ;;  %s4179_s16 = scalar_lea.vmem [#allocation5], %s3412_s14  ;;  %s5279_s17 = scalar_lea.vmem [#allocation6], %s3412_s14 }
  0x3c   : > { %v152_v20 = vadd.s32 16, %v3826_v1  ;;  %v3869_v37 = vadd.s32 24, %v3826_v1  ;;  %s3172_s22 = sshll.u32 %s4179_s16, 4  ;;  %s3189_s23 = sshll.u32 %s5279_s17, 4  ;;  %s5514_s22 = int_to_ptr.vmem [resolvable:$true] %s3172_s22  ;;  %s5521_s23 = int_to_ptr.vmem [resolvable:$true] %s3189_s23 }
  0x3d   : > { %v165_v7 = vcvt.s32.f32 %v158_v3  ;;  %v3836_v8 = vadd.s32 %v3828_v2, %v151_v6  ;;  %v3838_v10 = vrot.slane %v172_v9, %v176_v4  ;;  %v3840_v11 = vrot.slane %v172_v9, %v180_v5  ;;  %s5512_s25 = scalar_lea.hbm %s5599_s1, %s3410_s21  ;;  %s5519_s28 = scalar_lea.hbm %s5600_s2, %s3410_s21 }
  0x3e   : > { %v3865_v29 = vadd.s32 %v3828_v2, %v152_v20  ;;  %s3616_s30 = scalar_lea.vmem %s5514_s22, 3584  ;;  %p5789_p6 = scmp.ne.s32.totalorder %s5674_s19, 0 }
  0x3f   : > { %v166_v12 = vcvt.s32.f32 %v3836_v8  ;;  %v3844_v13 = vmul.f32 %v3838_v10, %v165_v7  ;;  %v3847_v14 = vmul.f32 %v3840_v11, %v165_v7  ;;  %p3617_p5 = scmp.ne.s32.totalorder %s5514_s22, %s3616_s30  ;;  %s3723_s3 = smov [#allocation5]  }
  0x40   : > { %v167_v36 = vcvt.s32.f32 %v3865_v29  ;;  %s3620_s4 = sshll.u32 %s3723_s3, 4  ;;  %s3621_s4 = int_to_ptr.vmem [resolvable:$false] %s3620_s4 }
  0x41   : > { %v3852_v15 = vmul.f32 %v3838_v10, %v166_v12  ;;  %v198_v16 = vand.u32 2147483647, %v3844_v13  ;;  %v201_v17 = vand.u32 2139095040, %v3844_v13  ;;  %v301_v18 = vand.u32 2147483647, %v3847_v14  ;;  %p3618_p9 = pnand %p3617_p5, %p5789_p6  ;;  %s3622_s5 = scalar_lea.vmem %s3621_s4, 7168 }
  0x42   : > { %v304_v19 = vand.u32 2139095040, %v3847_v14  ;;  %v3964_v8 = vmul.f32 %v3838_v10, %v167_v36  ;;  %p3623_p12 = scmp.lt.s32.totalorder %s5514_s22, %s3621_s4  ;;  %p3624_p2 = scmp.lt.s32.totalorder %s3622_s5, %s3616_s30 }
  0x43   : > { %v202_v21 = vshrl.u32 %v201_v17, 23  ;;  %v205_v22 = vand.u32 8388607, %v198_v16  ;;  %v308_v24 = vand.u32 8388607, %v301_v18  ;;  %v407_v25 = vand.u32 2139095040, %v3852_v15  ;;  %p3619_p10 = pneg %p3618_p9 }
  0x44   : > { %v305_v23 = vshrl.u32 %v304_v19, 23  ;;  %v404_v41 = vand.u32 2147483647, %v3852_v15  ;;  %5682 = vst [vmem:[#allocation12_spill] sm:$0xff] %v3964_v8  ;;  %p3625_p3 = por %p3624_p2, %p3623_p12 }
  0x45   : > { %v3288_v26 = vadd.s32 4294967169, %v202_v21  ;;  %v408_v28 = vshrl.u32 %v407_v25, 23  ;;  %v206_v31 = vor.u32 8388608, %v205_v22  ;;  %v309_v32 = vor.u32 8388608, %v308_v24 }
  0x46   : > { %v3292_v27 = vadd.s32 4294967169, %v305_v23  ;;  %p3626_p4 = pnand %p3625_p3, %p3619_p10 }
  0x47   : > { %v208_v30 = vadd.s32 1, %v3288_v26  ;;  %v3296_v34 = vadd.s32 4294967169, %v408_v28  ;;  %v3872_v42 = vshll.u32 %v206_v31, 8  ;;  %v3874_v44 = vshll.u32 %v309_v32, 8 }
  0x48   : > { %v311_v33 = vadd.s32 1, %v3292_v27 }
  0x49   : > { %vm209_vm0 = vcmp.gt.s32.totalorder %v208_v30, 0  ;;  %v3876_v45 = vadd.s32 1, %v3296_v34 }
  0x4a   : > { %v210_v35 = vsel %vm209_vm0, %v208_v30, 0  ;;  %vm312_vm1 = vcmp.gt.s32.totalorder %v311_v33, 0  ;;  %vm200_vm0 = vcmp.lt.s32.totalorder %v3844_v13, 0 }
  0x4b   : > { %v211_v38 = vshrl.u32 %v210_v35, 5  ;;  %v212_v39 = vand.u32 31, %v210_v35  ;;  %v313_v40 = vsel %vm312_vm1, %v311_v33, 0  ;;  %vm415_vm6 = vcmp.gt.s32.totalorder %v3876_v45, 0 }
  0x4c   : > { %v315_v43 = vand.u32 31, %v313_v40  ;;  %v3883_v57 = vshrl.u32 %v313_v40, 5 }
  0x4d   : > { %v213_v46 = vsub.s32 32, %v212_v39  ;;  %v215_v48 = vshll.u32 %v5655_v47, %v212_v39  ;;  %v218_v50 = vshll.u32 %v5619_v49, %v212_v39  ;;  %v221_v52 = vshll.u32 %v5617_v51, %v212_v39 }
  0x4e   : > { %v224_v54 = vshll.u32 %v5615_v53, %v212_v39  ;;  %v227_v56 = vshll.u32 %v5666_v55, %v212_v39  ;;  %vm230_vm2 = vcmp.lt.s32.totalorder %v211_v38, 1  ;;  %vm231_vm3 = vcmp.lt.s32.totalorder %v211_v38, 2 }
  0x4f   : > { %v214_v58 = vshrl.u32 %v5655_v47, %v213_v46  ;;  %v216_v59 = vshrl.u32 %v5619_v49, %v213_v46  ;;  %v219_v60 = vshrl.u32 %v5617_v51, %v213_v46  ;;  %v222_v61 = vshrl.u32 %v5615_v53, %v213_v46 }
  0x50   : > { %v225_v62 = vshrl.u32 %v5666_v55, %v213_v46  ;;  %v228_v0 = vshrl.u32 %v5624_v63, %v213_v46  ;;  %vm233_vm4 = vcmp.lt.s32.totalorder %v211_v38, 4  ;;  %v316_v6 = vsub.s32 32, %v315_v43 }
  0x51   : > { %v217_v3 = vor.u32 %v216_v59, %v215_v48  ;;  %v220_v4 = vor.u32 %v219_v60, %v218_v50  ;;  %v223_v5 = vor.u32 %v222_v61, %v221_v52  ;;  %vm232_vm5 = vcmp.lt.s32.totalorder %v211_v38, 3 }
  0x52   : > { %v226_v7 = vor.u32 %v225_v62, %v224_v54  ;;  %v229_v9 = vor.u32 %v228_v0, %v227_v56  ;;  %v318_v17 = vshll.u32 %v5655_v47, %v315_v43  ;;  %v321_v26 = vshll.u32 %v5619_v49, %v315_v43 }
  0x53   : > { %v234_v19 = vsel %vm230_vm2, %v214_v58, %v217_v3  ;;  %v235_v20 = vsel %vm233_vm4, %v223_v5, 2102212464  ;;  %v238_v21 = vsel %vm230_vm2, %v217_v3, %v220_v4  ;;  %v242_v22 = vsel %vm230_vm2, %v220_v4, %v223_v5 }
  0x54   : > { %v236_v23 = vsel %vm232_vm5, %v220_v4, %v235_v20  ;;  %v239_v24 = vsel %vm233_vm4, %v226_v7, 920167782  ;;  %v243_v25 = vsel %vm233_vm4, %v229_v9, 1326507024  ;;  %v317_v30 = vshrl.u32 %v5655_v47, %v316_v6 }
  0x55   : > { %v240_v27 = vsel %vm232_vm5, %v223_v5, %v239_v24  ;;  %v244_v28 = vsel %vm232_vm5, %v226_v7, %v243_v25  ;;  %v319_v31 = vshrl.u32 %v5619_v49, %v316_v6  ;;  %v237_v32 = vsel %vm231_vm3, %v234_v19, %v236_v23 }
  0x56   : > { %v241_v33 = vsel %vm231_vm3, %v238_v21, %v240_v27  ;;  %v245_v34 = vsel %vm231_vm3, %v242_v22, %v244_v28  ;;  %v322_v35 = vshrl.u32 %v5617_v51, %v316_v6  ;;  %v324_v54 = vshll.u32 %v5617_v51, %v315_v43 }
  0x57   : > { %v3904_v39 = vmul.u32.u64.low %v3872_v42, %v245_v34  ;;  %v3905_v40 = vmul.u32.u64.high %v3872_v42, %v245_v34, %v3904_v39  ;;  %v3908_v46 = vmul.u32.u64.low %v3872_v42, %v241_v33  ;;  %v3909_v48 = vmul.u32.u64.high %v3872_v42, %v241_v33, %v3908_v46 }
  0x58   : > { %v320_v50 = vor.u32 %v319_v31, %v318_v17  ;;  %v323_v52 = vor.u32 %v322_v35, %v321_v26  ;;  %v325_v56 = vshrl.u32 %v5615_v53, %v316_v6  ;;  %v327_v38 = vshll.u32 %v5615_v53, %v315_v43 }
  0x59   : > { %v328_v58 = vshrl.u32 %v5666_v55, %v316_v6  ;;  %v330_v59 = vshll.u32 %v5666_v55, %v315_v43  ;;  %v331_v60 = vshrl.u32 %v5624_v63, %v316_v6  ;;  %v253_v61 = vmul.u32 %v3872_v42, %v237_v32 }
  0x5a   : > { %v326_v62 = vor.u32 %v325_v56, %v324_v54  ;;  %vm333_vm7 = vcmp.lt.s32.totalorder %v3883_v57, 1  ;;  %vm334_vm8 = vcmp.lt.s32.totalorder %v3883_v57, 2  ;;  %vm255_vm9 = vc.u32 %v3905_v40, %v3908_v46 }
  0x5b   : > { %v256_v0 = vadd.s32 1, %v3909_v48  ;;  %v329_v3 = vor.u32 %v328_v58, %v327_v38  ;;  %vm335_vm10 = vcmp.lt.s32.totalorder %v3883_v57, 3  ;;  %v332_v4 = vor.u32 %v331_v60, %v330_v59 }
  0x5c   : > { %vm336_vm11 = vcmp.lt.s32.totalorder %v3883_v57, 4  ;;  %v337_v43 = vsel %vm333_vm7, %v317_v30, %v320_v50  ;;  %v341_v5 = vsel %vm333_vm7, %v320_v50, %v323_v52  ;;  %v345_v9 = vsel %vm333_vm7, %v323_v52, %v326_v62 }
  0x5d   : > { %v257_v42 = vsel %vm255_vm9, %v256_v0, %v3909_v48  ;;  %v338_v6 = vsel %vm336_vm11, %v326_v62, 2102212464  ;;  %v342_v7 = vsel %vm336_vm11, %v329_v3, 920167782  ;;  %v346_v21 = vsel %vm336_vm11, %v332_v4, 1326507024 }
  0x5e   : > { %v258_v17 = vadd.s32 %v257_v42, %v253_v61  ;;  %v339_v19 = vsel %vm335_vm10, %v323_v52, %v338_v6  ;;  %v343_v20 = vsel %vm335_vm10, %v326_v62, %v342_v7  ;;  %v347_v24 = vsel %vm335_vm10, %v329_v3, %v346_v21 }
  0x5f   : > { %v340_v22 = vsel %vm334_vm8, %v337_v43, %v339_v19  ;;  %v344_v23 = vsel %vm334_vm8, %v341_v5, %v343_v20  ;;  %v416_v25 = vsel %vm415_vm6, %v3876_v45, 0  ;;  %v348_v27 = vsel %vm334_vm8, %v345_v9, %v347_v24 }
  0x60   : > { %v259_v26 = vadd.s32 536870912, %v258_v17  ;;  %v3937_v28 = vmul.u32.u64.low %v3874_v44, %v344_v23  ;;  %v3938_v30 = vmul.u32.u64.high %v3874_v44, %v344_v23, %v3937_v28  ;;  %v411_v33 = vand.u32 8388607, %v404_v41 }
  0x61   : > { %v3942_v31 = vmul.u32.u64.low %v3874_v44, %v348_v27  ;;  %v3943_v32 = vmul.u32.u64.high %v3874_v44, %v348_v27, %v3942_v31  ;;  %v3950_v45 = vmul.f32 %v3840_v11, %v166_v12  ;;  %v418_v57 = vand.u32 31, %v416_v25 }
  0x62   : > { %v3952_v34 = vshrl.u32 %v259_v26, 30  ;;  %v356_v35 = vmul.u32 %v3874_v44, %v340_v22  ;;  %v3957_v39 = vadd.s32 %v3828_v2, %v3869_v37  ;;  %v359_v50 = vadd.s32 1, %v3938_v30 }
  0x63   : > { %5681 = vst [vmem:[#allocation11_spill] sm:$0xff] %v3950_v45  ;;  %v419_v52 = vsub.s32 32, %v418_v57  ;;  %vm358_vm12 = vc.u32 %v3943_v32, %v3937_v28  ;;  %v412_v12 = vor.u32 8388608, %v411_v33  ;;  %v510_v44 = vand.u32 2139095040, %v3950_v45 }
  0x64   : > { %v261_v48 = vshll.u32 %v3952_v34, 30  ;;  %v3972_v37 = vmul.f32 %v3840_v11, %v167_v36  ;;  %v360_v56 = vsel %vm358_vm12, %v359_v50, %v3938_v30  ;;  %v417_v38 = vshrl.u32 %v416_v25, 5 }
  0x65   : > { %v507_v58 = vand.u32 2147483647, %v3950_v45  ;;  %v361_v59 = vadd.s32 %v360_v56, %v356_v35  ;;  %v421_v60 = vshll.u32 %v5655_v47, %v418_v57  ;;  %v422_v61 = vshrl.u32 %v5619_v49, %v419_v52 }
  0x66   : > { %5683 = vst [vmem:[#allocation13_spill] sm:$0xff] %v3972_v37  ;;  %v3974_v54 = vsub.s32 %v258_v17, %v261_v48  ;;  %v424_v62 = vshll.u32 %v5619_v49, %v418_v57  ;;  %v425_v29 = vshrl.u32 %v5617_v51, %v419_v52  ;;  %v427_v36 = vshll.u32 %v5617_v51, %v418_v57 }
  0x67   : > { %v428_v3 = vshrl.u32 %v5615_v53, %v419_v52  ;;  %v362_v4 = vadd.s32 536870912, %v361_v59  ;;  %v430_v43 = vshll.u32 %v5615_v53, %v418_v57  ;;  %v3986_v5 = vshll.u32 %v412_v12, 8 }
  0x68   : > { %v264_v0 = vsub.s32 0, %v3974_v54  ;;  %v511_v42 = vshrl.u32 %v510_v44, 23  ;;  %v254_v6 = vadd.s32 %v3908_v46, %v3905_v40  ;;  %v420_v9 = vshrl.u32 %v5655_v47, %v419_v52 }
  0x69   : > { %vm439_vm13 = vcmp.lt.s32.totalorder %v417_v38, 4  ;;  %v3992_v17 = vshrl.u32 %v362_v4, 30  ;;  %v423_v19 = vor.u32 %v422_v61, %v421_v60  ;;  %v431_v20 = vshrl.u32 %v5666_v55, %v419_v52 }
  0x6a   : > { %v3289_v7 = vmin.u32 %v264_v0, %v3974_v54  ;;  %v433_v21 = vshll.u32 %v5666_v55, %v418_v57  ;;  %v426_v23 = vor.u32 %v425_v29, %v424_v62  ;;  %v429_v24 = vor.u32 %v428_v3, %v427_v36 }
  0x6b   : > { %v434_v25 = vshrl.u32 %v5624_v63, %v419_v52  ;;  %v364_v26 = vshll.u32 %v3992_v17, 30  ;;  %v432_v40 = vor.u32 %v431_v20, %v430_v43  ;;  %vm436_vm14 = vcmp.lt.s32.totalorder %v417_v38, 1 }
  0x6c   : > { %v266_v22 = vclz %v3289_v7  ;;  %vm438_vm15 = vcmp.lt.s32.totalorder %v417_v38, 3  ;;  %v441_v30 = vsel %vm439_vm13, %v429_v24, 2102212464  ;;  %v3300_v31 = vadd.s32 4294967169, %v511_v42 }
  0x6d   : > { %v435_v27 = vor.u32 %v434_v25, %v433_v21  ;;  %v4000_v33 = vsub.s32 %v361_v59, %v364_v26  ;;  %vm437_vm1 = vcmp.lt.s32.totalorder %v417_v38, 2  ;;  %v440_v57 = vsel %vm436_vm14, %v420_v9, %v423_v19 }
  0x6e   : > { %v3290_v46 = vadd.s32 4294967294, %v266_v22  ;;  %v445_v35 = vsel %vm439_vm13, %v432_v40, 920167782  ;;  %v444_v48 = vsel %vm436_vm14, %v423_v19, %v426_v23  ;;  %v442_v56 = vsel %vm438_vm15, %v426_v23, %v441_v30 }
  0x6f   : > { %v446_v50 = vsel %vm438_vm15, %v429_v24, %v445_v35  ;;  %v449_v52 = vsel %vm439_vm13, %v435_v27, 1326507024  ;;  %v367_v44 = vsub.s32 0, %v4000_v33  ;;  %v448_v59 = vsel %vm436_vm14, %v426_v23, %v429_v24 }
  0x70   : > { %vm3291_vm2 = vcmp.lt.s32.totalorder %v3290_v46, 0  ;;  %vm4012_vm3 = vcmp.le.f32.partialorder %v198_v16, 0.7853982  ;;  %v450_v29 = vsel %vm438_vm15, %v432_v40, %v449_v52  ;;  %v284_v36 = vsub.s32 4, %v3952_v34 }
  0x71   : > { %v269_v12 = vsel %vm3291_vm2, 0, %v3290_v46  ;;  %v3293_v3 = vmin.u32 %v367_v44, %v4000_v33  ;;  %v447_v4 = vsel %vm437_vm1, %v444_v48, %v446_v50  ;;  %v4023_v43 = vand.u32 8388607, %v507_v58 }
  0x72   : > { %v270_v61 = vsub.s32 32, %v269_v12  ;;  %v271_v62 = vshll.u32 %v3974_v54, %v269_v12  ;;  %v274_v0 = vsub.s32 4294967266, %v269_v12  ;;  %vm303_vm4 = vcmp.lt.s32.totalorder %v3847_v14, 0 }
  0x73   : > { %v443_v7 = vsel %vm437_vm1, %v440_v57, %v442_v56  ;;  %v451_v54 = vsel %vm437_vm1, %v448_v59, %v450_v29  ;;  %v369_v9 = vclz %v3293_v3  ;;  %v517_v21 = vadd.s32 1, %v3300_v31 }
  0x74   : > { %v272_v16 = vshrl.u32 %v254_v6, %v270_v61  ;;  %v275_v42 = vadd.s32 127, %v274_v0  ;;  %v4029_v19 = vmul.u32.u64.low %v3986_v5, %v451_v54  ;;  %v4030_v20 = vmul.u32.u64.high %v3986_v5, %v451_v54, %v4029_v19 }
  0x75   : > { %v4033_v24 = vmul.u32.u64.low %v3986_v5, %v447_v4  ;;  %v4034_v25 = vmul.u32.u64.high %v3986_v5, %v447_v4, %v4033_v24  ;;  %v357_v6 = vadd.s32 %v3937_v28, %v3943_v32  ;;  %v3294_v26 = vadd.s32 4294967294, %v369_v9 }
  0x76   : > { %v273_v22 = vor.u32 %v272_v16, %v271_v62  ;;  %v276_v23 = vshll.u32 %v275_v42, 23  ;;  %v515_v38 = vor.u32 8388608, %v4023_v43  ;;  %vm518_vm5 = vcmp.gt.s32.totalorder %v517_v21, 0 }
  0x77   : > { %v285_v27 = vsel %vm200_vm0, %v284_v36, %v3952_v34  ;;  %v519_v30 = vsel %vm518_vm5, %v517_v21, 0  ;;  %vm3295_vm6 = vcmp.lt.s32.totalorder %v3294_v26, 0  ;;  %v387_v31 = vsub.s32 4, %v3992_v17 }
  0x78   : > { %v277_v40 = vor.u32 4788187, %v276_v23  ;;  %v280_v46 = vcvt.s32.f32 %v273_v22  ;;  %v459_v57 = vmul.u32 %v3986_v5, %v443_v7  ;;  %vm461_vm7 = vc.u32 %v4030_v20, %v4033_v24 }
  0x79   : > { %v372_v32 = vsel %vm3295_vm6, 0, %v3294_v26  ;;  %v462_v35 = vadd.s32 1, %v4034_v25  ;;  %v521_v48 = vand.u32 31, %v519_v30  ;;  %v4050_v50 = vsel %vm4012_vm3, 0, %v285_v27 }
  0x7a   : > { %v278_v28 = vand.u32 2147483647, %v277_v40  ;;  %v373_v52 = vsub.s32 32, %v372_v32  ;;  %v374_v34 = vshll.u32 %v4000_v33, %v372_v32  ;;  %v377_v12 = vsub.s32 4294967266, %v372_v32 }
  0x7b   : > { %v4054_v56 = vand.u32 3, %v4050_v50  ;;  %v463_v5 = vsel %vm461_vm7, %v462_v35, %v4034_v25  ;;  %v522_v59 = vsub.s32 32, %v521_v48  ;;  %vm4059_vm8 = vcmp.le.f32.partialorder %v301_v18, 0.7853982 }
  0x7c   : > { %v281_v44 = vmul.f32 %v280_v46, %v278_v28  ;;  %v375_v62 = vshrl.u32 %v357_v6, %v373_v52  ;;  %v378_v0 = vadd.s32 127, %v377_v12  ;;  %v388_v33 = vsel %vm303_vm4, %v387_v31, %v3992_v17 }
  0x7d   : > { %v464_v29 = vadd.s32 %v463_v5, %v459_v57  ;;  %v4066_v3 = vshrl.u32 %v519_v30, 5  ;;  %v524_v4 = vshll.u32 %v5655_v47, %v521_v48  ;;  %v527_v16 = vshll.u32 %v5619_v49, %v521_v48 }
  0x7e   : > { %v282_v36 = vxor.u32 2147483648, %v281_v44  ;;  %v376_v42 = vor.u32 %v375_v62, %v374_v34  ;;  %v379_v7 = vshll.u32 %v378_v0, 23  ;;  %v525_v54 = vshrl.u32 %v5619_v49, %v522_v59 }
  0x7f   : > { %v465_v18 = vadd.s32 536870912, %v464_v29  ;;  %v528_v19 = vshrl.u32 %v5617_v51, %v522_v59  ;;  %v530_v17 = vshll.u32 %v5617_v51, %v521_v48  ;;  %v531_v21 = vshrl.u32 %v5615_v53, %v522_v59 }
  0x80   : > { %v283_v9 = vsel %vm200_vm0, %v282_v36, %v281_v44  ;;  %v380_v23 = vor.u32 4788187, %v379_v7  ;;  %v383_v25 = vcvt.s32.f32 %v376_v42  ;;  %v533_v26 = vshll.u32 %v5615_v53, %v521_v48 }
  0x81   : > { %v286_v22 = vsel %vm4012_vm3, %v3844_v13, %v283_v9  ;;  %v4079_v6 = vshrl.u32 %v465_v18, 30  ;;  %v534_v40 = vshrl.u32 %v5666_v55, %v522_v59  ;;  %vm539_vm9 = vcmp.lt.s32.totalorder %v4066_v3, 1 }
  0x82   : > { %3532 = vcosq.f32 %v286_v22  ;;  %v381_v46 = vand.u32 2147483647, %v380_v23  ;;  %v526_v30 = vor.u32 %v525_v54, %v524_v4  ;;  %v529_v31 = vor.u32 %v528_v19, %v527_v16 }
  0x83   : > { %3534 = vsinq.f32 %v286_v22  ;;  %v467_v27 = vshll.u32 %v4079_v6, 30  ;;  %v535_v57 = vor.u32 %v534_v40, %v533_v26  ;;  %v536_v60 = vshll.u32 %v5666_v55, %v521_v48 }
  0x84   : > { %v537_v28 = vshrl.u32 %v5624_v63, %v522_v59  ;;  %vm293_vm10 = vcmp.eq.s32.totalorder %v4054_v56, 0  ;;  %v384_v32 = vmul.f32 %v383_v25, %v381_v46  ;;  %v523_v52 = vshrl.u32 %v5655_v47, %v522_v59 }
  0x85   : > { %v4088_v35 = vsub.s32 %v464_v29, %v467_v27  ;;  %v532_v34 = vor.u32 %v531_v21, %v530_v17  ;;  %vm292_vm11 = vcmp.lt.s32.totalorder %v4054_v56, 2  ;;  %vm296_vm12 = vcmp.eq.s32.totalorder %v4054_v56, 2 }
  0x86   : > { %v4095_v12 = vsel %vm4059_vm8, 0, %v388_v33  ;;  %vm541_vm13 = vcmp.lt.s32.totalorder %v4066_v3, 3  ;;  %vm542_vm14 = vcmp.lt.s32.totalorder %v4066_v3, 4  ;;  %vm290_vm15 = vweird.f32 %v3844_v13 }
  0x87   : > { %v385_v48 = vxor.u32 2147483648, %v384_v32  ;;  %v470_v44 = vsub.s32 0, %v4088_v35  ;;  %v538_v5 = vor.u32 %v537_v28, %v536_v60  ;;  %v544_v59 = vsel %vm542_vm14, %v532_v34, 2102212464 }
  0x88   : > { %vm540_vm0 = vcmp.lt.s32.totalorder %v4066_v3, 2  ;;  %v547_v62 = vsel %vm539_vm9, %v526_v30, %v529_v31  ;;  %v548_v0 = vsel %vm542_vm14, %v535_v57, 920167782  ;;  %v555_v33 = vshll.u32 %v515_v38, 8 }
  0x89   : > { %v386_v29 = vsel %vm303_vm4, %v385_v48, %v384_v32  ;;  %v4116_v36 = vand.u32 3, %v4095_v12  ;;  %v3297_v4 = vmin.u32 %v470_v44, %v4088_v35  ;;  %v543_v16 = vsel %vm539_vm9, %v523_v52, %v526_v30 }
  0x8a   : > { %v389_v42 = vsel %vm4059_vm8, %v3847_v14, %v386_v29  ;;  %v545_v43 = vsel %vm541_vm13, %v529_v31, %v544_v59  ;;  %v549_v38 = vsel %vm541_vm13, %v532_v34, %v548_v0  ;;  %v551_v7 = vsel %vm539_vm9, %v529_v31, %v532_v34 }
  0x8b   : > { %3536 = vcosq.f32 %v389_v42  ;;  %v472_v18 = vclz %v3297_v4  ;;  %v550_v54 = vsel %vm540_vm0, %v547_v62, %v549_v38  ;;  %v552_v9 = vsel %vm542_vm14, %v538_v5, 1326507024 }
  0x8c   : > { %v4134_v19 = vpop.eup %3532  ;;  %3538 = vsinq.f32 %v389_v42  ;;  %v553_v61 = vsel %vm541_vm13, %v535_v57, %v552_v9  ;;  %v4139_v17 = vmul.u32.u64.low %v555_v33, %v550_v54  ;;  %v4140_v21 = vmul.u32.u64.high %v555_v33, %v550_v54, %v4139_v17 }
  0x8d   : > { %v4143_v22 = vpop.eup %3534  ;;  %v5610_v23 = vxor.u32 2147483648, %v4134_v19  ;;  %v3298_v25 = vadd.s32 4294967294, %v472_v18  ;;  %v546_v26 = vsel %vm540_vm0, %v543_v16, %v545_v43  ;;  %v554_v40 = vsel %vm540_vm0, %v551_v7, %v553_v61 }
  0x8e   : > { %v5611_v46 = vxor.u32 2147483648, %v4143_v22  ;;  %v460_v27 = vadd.s32 %v4033_v24, %v4030_v20  ;;  %v4153_v30 = vmul.u32.u64.low %v555_v33, %v554_v40  ;;  %v4154_v31 = vmul.u32.u64.high %v555_v33, %v554_v40, %v4153_v30 }
  0x8f   : > { %v298_v57 = vsel %vm296_vm12, %v5610_v23, %v4143_v22  ;;  %vm3299_vm1 = vcmp.lt.s32.totalorder %v3298_v25, 0  ;;  %v490_v60 = vsub.s32 4, %v4079_v6  ;;  %v613_v3 = vand.u32 2139095040, %v3964_v8 }
  0x90   : > { %v295_v20 = vsel %vm293_vm10, %v4134_v19, %v5611_v46  ;;  %v475_v24 = vsel %vm3299_vm1, 0, %v3298_v25  ;;  %v562_v28 = vmul.u32 %v555_v33, %v546_v26  ;;  %v565_v32 = vadd.s32 1, %v4140_v21 }
  0x91   : > { %v299_v52 = vsel %vm292_vm11, %v295_v20, %v298_v57  ;;  %v476_v34 = vsub.s32 32, %v475_v24  ;;  %v477_v48 = vshll.u32 %v4088_v35, %v475_v24  ;;  %v480_v44 = vsub.s32 4294967266, %v475_v24 }
  0x92   : > { %v300_v5 = vsel %vm290_vm15, nan, %v299_v52  ;;  %vm564_vm2 = vc.u32 %v4154_v31, %v4139_v17  ;;  %v610_v59 = vand.u32 2147483647, %v3964_v8  ;;  %v614_v62 = vshrl.u32 %v613_v3, 23 }
  0x93   : > { %3096 = vst [vmem:[%s4179_s16] sm:$0xff] %v300_v5  ;;  %3110 = vst [vmem:[%s4179_s16 + $0x10] sm:$0xff] %v300_v5  ;;  %vm406_vm3 = vcmp.lt.s32.totalorder %v3852_v15, 0  ;;  %v478_v56 = vshrl.u32 %v460_v27, %v476_v34  ;;  %v481_v35 = vadd.s32 127, %v480_v44  ;;  %v566_v0 = vsel %vm564_vm2, %v565_v32, %v4140_v21 }
  0x94   : > { %vm395_vm4 = vcmp.lt.s32.totalorder %v4116_v36, 2  ;;  %vm396_vm5 = vcmp.eq.s32.totalorder %v4116_v36, 0  ;;  %v567_v33 = vadd.s32 %v566_v0, %v562_v28  ;;  %v3304_v29 = vadd.s32 4294967169, %v614_v62 }
  0x95   : > { %v4187_v4 = vpop.eup %3536  ;;  %vm399_vm6 = vcmp.eq.s32.totalorder %v4116_v36, 2  ;;  %v479_v16 = vor.u32 %v478_v56, %v477_v48  ;;  %v482_v42 = vshll.u32 %v481_v35, 23  ;;  %v491_v43 = vsel %vm406_vm3, %v490_v60, %v4079_v6 }
  0x96   : > { %v4193_v38 = vpop.eup %3538  ;;  %v5608_v7 = vxor.u32 2147483648, %v4187_v4  ;;  %v568_v18 = vadd.s32 536870912, %v567_v33  ;;  %v617_v54 = vand.u32 8388607, %v610_v59  ;;  %v620_v9 = vadd.s32 1, %v3304_v29 }
  0x97   : > { %v5609_v61 = vxor.u32 2147483648, %v4193_v38  ;;  %v483_v21 = vor.u32 4788187, %v482_v42  ;;  %v486_v25 = vcvt.s32.f32 %v479_v16  ;;  %v716_v26 = vand.u32 2139095040, %v3972_v37 }
  0x98   : > { %vm393_vm7 = vweird.f32 %v3847_v14  ;;  %v401_v6 = vsel %vm399_vm6, %v5608_v7, %v4193_v38  ;;  %v4204_v40 = vshrl.u32 %v568_v18, 30  ;;  %vm621_vm8 = vcmp.gt.s32.totalorder %v620_v9, 0 }
  0x99   : > { %v398_v27 = vsel %vm396_vm5, %v4187_v4, %v5609_v61  ;;  %vm4213_vm9 = vcmp.le.f32.partialorder %v404_v41, 0.7853982  ;;  %v484_v57 = vand.u32 2147483647, %v483_v21  ;;  %v622_v60 = vsel %vm621_vm8, %v620_v9, 0 }
  0x9a   : > { %v402_v3 = vsel %vm395_vm4, %v398_v27, %v401_v6  ;;  %v4221_v20 = vsel %vm4213_vm9, 0, %v491_v43  ;;  %v570_v24 = vshll.u32 %v4204_v40, 30  ;;  %v618_v28 = vor.u32 8388608, %v617_v54 }
  0x9b   : > { %v403_v32 = vsel %vm393_vm7, nan, %v402_v3  ;;  %v487_v52 = vmul.f32 %v486_v25, %v484_v57  ;;  %v624_v41 = vand.u32 31, %v622_v60  ;;  %v717_v34 = vshrl.u32 %v716_v26, 23 }
  0x9c   : > { %3097 = vst [vmem:[%s4179_s16 + $0x8] sm:$0xff] %v403_v32  ;;  %3111 = vst [vmem:[%s4179_s16 + $0x18] sm:$0xff] %v403_v32  ;;  %v4229_v48 = vand.u32 3, %v4221_v20  ;;  %v4231_v36 = vsub.s32 %v567_v33, %v570_v24  ;;  %v4233_v44 = vshrl.u32 %v622_v60, 5  ;;  %v168_v5 = vcvt.s32.f32 %v3957_v39 }
  0x9d   : > { %v488_v62 = vxor.u32 2147483648, %v487_v52  ;;  %v563_v56 = vadd.s32 %v4139_v17, %v4154_v31  ;;  %v625_v35 = vsub.s32 32, %v624_v41  ;;  %v627_v0 = vshll.u32 %v5655_v47, %v624_v41 }
  0x9e   : > { %v573_v29 = vsub.s32 0, %v4231_v36  ;;  %v630_v16 = vshll.u32 %v5619_v49, %v624_v41  ;;  %v4241_v42 = vshll.u32 %v618_v28, 8  ;;  %v713_v33 = vand.u32 2147483647, %v3972_v37 }
  0x9f   : > { %v489_v43 = vsel %vm406_vm3, %v488_v62, %v487_v52  ;;  %v628_v18 = vshrl.u32 %v5619_v49, %v625_v35  ;;  %v631_v54 = vshrl.u32 %v5617_v51, %v625_v35  ;;  %v3308_v9 = vadd.s32 4294967169, %v717_v34 }
  0xa0   : > { %v492_v17 = vsel %vm4213_vm9, %v3852_v15, %v489_v43  ;;  %v3301_v31 = vmin.u32 %v573_v29, %v4231_v36  ;;  %v633_v21 = vshll.u32 %v5617_v51, %v624_v41  ;;  %vm642_vm10 = vcmp.lt.s32.totalorder %v4233_v44, 1 }
  0xa1   : > { %3540 = vcosq.f32 %v492_v17  ;;  %v626_v25 = vshrl.u32 %v5655_v47, %v625_v35  ;;  %v629_v26 = vor.u32 %v628_v18, %v627_v0  ;;  %v632_v6 = vor.u32 %v631_v54, %v630_v16 }
  0xa2   : > { %3542 = vsinq.f32 %v492_v17  ;;  %v575_v27 = vclz %v3301_v31  ;;  %v634_v57 = vshrl.u32 %v5615_v53, %v625_v35  ;;  %v636_v60 = vshll.u32 %v5615_v53, %v624_v41 }
  0xa3   : > { %vm502_vm11 = vcmp.eq.s32.totalorder %v4229_v48, 2  ;;  %v637_v30 = vshrl.u32 %v5666_v55, %v625_v35  ;;  %v639_v3 = vshll.u32 %v5666_v55, %v624_v41  ;;  %v640_v24 = vshrl.u32 %v5624_v63, %v625_v35 }
  0xa4   : > { %vm643_vm12 = vcmp.lt.s32.totalorder %v4233_v44, 2  ;;  %vm499_vm13 = vcmp.eq.s32.totalorder %v4229_v48, 0  ;;  %v3302_v28 = vadd.s32 4294967294, %v575_v27  ;;  %v635_v32 = vor.u32 %v634_v57, %v633_v21 }
  0xa5   : > { %vm644_vm14 = vcmp.lt.s32.totalorder %v4233_v44, 3  ;;  %vm645_vm0 = vcmp.lt.s32.totalorder %v4233_v44, 4  ;;  %v638_v52 = vor.u32 %v637_v30, %v636_v60  ;;  %v641_v34 = vor.u32 %v640_v24, %v639_v3 }
  0xa6   : > { %v646_v62 = vsel %vm642_vm10, %v626_v25, %v629_v26  ;;  %v650_v41 = vsel %vm642_vm10, %v629_v26, %v632_v6  ;;  %vm496_vm1 = vweird.f32 %v3852_v15  ;;  %vm509_vm2 = vcmp.lt.s32.totalorder %v3950_v45, 0 }
  0xa7   : > { %vm3303_vm3 = vcmp.lt.s32.totalorder %v3302_v28, 0  ;;  %v647_v35 = vsel %vm645_vm0, %v635_v32, 2102212464  ;;  %v654_v0 = vsel %vm642_vm10, %v632_v6, %v635_v32  ;;  %v723_v29 = vadd.s32 1, %v3308_v9 }
  0xa8   : > { %v578_v16 = vsel %vm3303_vm3, 0, %v3302_v28  ;;  %v648_v43 = vsel %vm644_vm14, %v632_v6, %v647_v35  ;;  %v651_v18 = vsel %vm645_vm0, %v638_v52, 920167782  ;;  %v655_v54 = vsel %vm645_vm0, %v641_v34, 1326507024 }
  0xa9   : > { %v579_v17 = vsub.s32 32, %v578_v16  ;;  %v580_v31 = vshll.u32 %v4231_v36, %v578_v16  ;;  %v583_v21 = vsub.s32 4294967266, %v578_v16  ;;  %v593_v25 = vsub.s32 4, %v4204_v40 }
  0xaa   : > { %v649_v26 = vsel %vm643_vm12, %v646_v62, %v648_v43  ;;  %v652_v27 = vsel %vm644_vm14, %v635_v32, %v651_v18  ;;  %v656_v9 = vsel %vm644_vm14, %v638_v52, %v655_v54  ;;  %vm724_vm4 = vcmp.gt.s32.totalorder %v723_v29, 0 }
  0xab   : > { %v581_v57 = vshrl.u32 %v563_v56, %v579_v17  ;;  %v584_v6 = vadd.s32 127, %v583_v21  ;;  %v653_v60 = vsel %vm643_vm12, %v650_v41, %v652_v27  ;;  %v657_v36 = vsel %vm643_vm12, %v654_v0, %v656_v9  ;;  %v4287_v30 = vpop.eup %3540 }
  0xac   : > { %v4290_v3 = vmul.u32.u64.low %v4241_v42, %v657_v36  ;;  %v4291_v24 = vmul.u32.u64.high %v4241_v42, %v657_v36, %v4290_v3  ;;  %v4294_v28 = vmul.u32.u64.low %v4241_v42, %v653_v60  ;;  %v4295_v32 = vmul.u32.u64.high %v4241_v42, %v653_v60, %v4294_v28  ;;  %v4298_v52 = vpop.eup %3542 }
  0xad   : > { %v5604_v56 = vxor.u32 2147483648, %v4287_v30  ;;  %vm4303_vm5 = vcmp.le.f32.partialorder %v507_v58, 0.7853982  ;;  %v582_v34 = vor.u32 %v581_v57, %v580_v31  ;;  %v585_v62 = vshll.u32 %v584_v6, 23 }
  0xae   : > { %v725_v41 = vsel %vm724_vm4, %v723_v29, 0  ;;  %vm498_vm6 = vcmp.lt.s32.totalorder %v4229_v48, 2  ;;  %v5607_v35 = vxor.u32 2147483648, %v4298_v52  ;;  %v720_v0 = vand.u32 8388607, %v713_v33 }
  0xaf   : > { %v727_v16 = vand.u32 31, %v725_v41  ;;  %v504_v58 = vsel %vm502_vm11, %v5604_v56, %v4298_v52  ;;  %v586_v43 = vor.u32 4788187, %v585_v62  ;;  %v589_v18 = vcvt.s32.f32 %v582_v34 }
  0xb0   : > { %v665_v29 = vmul.u32 %v4241_v42, %v649_v26  ;;  %v501_v54 = vsel %vm499_vm13, %v4287_v30, %v5607_v35  ;;  %v594_v17 = vsel %vm509_vm2, %v593_v25, %v4204_v40  ;;  %vm667_vm8 = vc.u32 %v4291_v24, %v4294_v28 }
  0xb1   : > { %v668_v31 = vadd.s32 1, %v4295_v32  ;;  %v505_v21 = vsel %vm498_vm6, %v501_v54, %v504_v58  ;;  %v587_v27 = vand.u32 2147483647, %v586_v43  ;;  %v4328_v9 = vshrl.u32 %v725_v41, 5 }
  0xb2   : > { %v728_v42 = vsub.s32 32, %v727_v16  ;;  %v506_v26 = vsel %vm496_vm1, nan, %v505_v21  ;;  %v730_v57 = vshll.u32 %v5655_v47, %v727_v16  ;;  %v733_v6 = vshll.u32 %v5619_v49, %v727_v16 }
  0xb3   : > { %v669_v48 = vsel %vm667_vm8, %v668_v31, %v4295_v32  ;;  %3098 = vst [vmem:[%s4179_s16 + $0x20] sm:$0xff] %v506_v26  ;;  %3112 = vst [vmem:[%s4179_s16 + $0x30] sm:$0xff] %v506_v26  ;;  %v590_v40 = vmul.f32 %v589_v18, %v587_v27  ;;  %v736_v36 = vshll.u32 %v5617_v51, %v727_v16  ;;  %v721_v43 = vor.u32 8388608, %v720_v0 }
  0xb4   : > { %v670_v25 = vadd.s32 %v669_v48, %v665_v29  ;;  %v731_v60 = vshrl.u32 %v5619_v49, %v728_v42  ;;  %v734_v3 = vshrl.u32 %v5617_v51, %v728_v42  ;;  %v737_v34 = vshrl.u32 %v5615_v53, %v728_v42 }
  0xb5   : > { %v739_v62 = vshll.u32 %v5615_v53, %v727_v16  ;;  %v740_v32 = vshrl.u32 %v5666_v55, %v728_v42  ;;  %v591_v41 = vxor.u32 2147483648, %v590_v40  ;;  %v742_v54 = vshll.u32 %v5666_v55, %v727_v16 }
  0xb6   : > { %v671_v58 = vadd.s32 536870912, %v670_v25  ;;  %v732_v31 = vor.u32 %v731_v60, %v730_v57  ;;  %v735_v18 = vor.u32 %v734_v3, %v733_v6  ;;  %v743_v21 = vshrl.u32 %v5624_v63, %v728_v42 }
  0xb7   : > { %v741_v29 = vor.u32 %v740_v32, %v739_v62  ;;  %v592_v27 = vsel %vm509_vm2, %v591_v41, %v590_v40  ;;  %v738_v48 = vor.u32 %v737_v34, %v736_v36  ;;  %vm745_vm9 = vcmp.lt.s32.totalorder %v4328_v9, 1 }
  0xb8   : > { %v672_v26 = vshrl.u32 %v671_v58, 30  ;;  %v595_v56 = vsel %vm4303_vm5, %v3950_v45, %v592_v27  ;;  %v729_v0 = vshrl.u32 %v5655_v47, %v728_v42  ;;  %vm747_vm10 = vcmp.lt.s32.totalorder %v4328_v9, 3 }
  0xb9   : > { %vm748_vm11 = vcmp.lt.s32.totalorder %v4328_v9, 4  ;;  %3544 = vcosq.f32 %v595_v56  ;;  %v744_v57 = vor.u32 %v743_v21, %v742_v54  ;;  %vm746_vm12 = vcmp.lt.s32.totalorder %v4328_v9, 2 }
  0xba   : > { %v673_v16 = vshll.u32 %v672_v26, 30  ;;  %3546 = vsinq.f32 %v595_v56  ;;  %v753_v6 = vsel %vm745_vm9, %v732_v31, %v735_v18  ;;  %v754_v40 = vsel %vm748_vm11, %v741_v29, 920167782 }
  0xbb   : > { %v761_v60 = vshll.u32 %v721_v43, 8  ;;  %v4361_v42 = vsel %vm4303_vm5, 0, %v594_v17  ;;  %v750_v3 = vsel %vm748_vm11, %v738_v48, 2102212464  ;;  %v755_v34 = vsel %vm747_vm10, %v738_v48, %v754_v40 }
  0xbc   : > { %v4363_v36 = vsub.s32 %v670_v25, %v673_v16  ;;  %v600_v56 = vand.u32 3, %v4361_v42  ;;  %v756_v62 = vsel %vm746_vm12, %v753_v6, %v755_v34  ;;  %v4375_v32 = vmul.f32 %v3838_v10, %v168_v5 }
  0xbd   : > { %v749_v17 = vsel %vm745_vm9, %v729_v0, %v732_v31  ;;  %v757_v25 = vsel %vm745_vm9, %v735_v18, %v738_v48  ;;  %v758_v41 = vsel %vm748_vm11, %v744_v57, 1326507024  ;;  %v751_v58 = vsel %vm747_vm10, %v735_v18, %v750_v3 }
  0xbe   : > { %5692 = vst [vmem:[#allocation14_spill] sm:$0xff] %v4375_v32  ;;  %v676_v44 = vsub.s32 0, %v4363_v36  ;;  %v759_v43 = vsel %vm747_vm10, %v741_v29, %v758_v41  ;;  %v4388_v54 = vmul.u32.u64.low %v761_v60, %v756_v62  ;;  %v4389_v21 = vmul.u32.u64.high %v761_v60, %v756_v62, %v4388_v54 }
  0xbf   : > { %vm599_vm13 = vweird.f32 %v3950_v45  ;;  %v696_v31 = vsub.s32 4, %v672_v26  ;;  %v760_v48 = vsel %vm746_vm12, %v757_v25, %v759_v43  ;;  %v819_v0 = vand.u32 2139095040, %v4375_v32 }
  0xc0   : > { %v3305_v27 = vmin.u32 %v676_v44, %v4363_v36  ;;  %v752_v18 = vsel %vm746_vm12, %v749_v17, %v751_v58  ;;  %v4399_v57 = vmul.u32.u64.low %v761_v60, %v760_v48  ;;  %v4400_v29 = vmul.u32.u64.high %v761_v60, %v760_v48, %v4399_v57 }
  0xc1   : > { %vm601_vm14 = vcmp.lt.s32.totalorder %v600_v56, 2  ;;  %vm612_vm0 = vcmp.lt.s32.totalorder %v3964_v8, 0  ;;  %v771_v6 = vadd.s32 1, %v4389_v21  ;;  %v820_v40 = vshrl.u32 %v819_v0, 23 }
  0xc2   : > { %v678_v16 = vclz %v3305_v27  ;;  %vm602_vm2 = vcmp.eq.s32.totalorder %v600_v56, 0  ;;  %vm605_vm3 = vcmp.eq.s32.totalorder %v600_v56, 2  ;;  %v666_v34 = vadd.s32 %v4294_v28, %v4291_v24 }
  0xc3   : > { %v4404_v3 = vpop.eup %3544  ;;  %v768_v17 = vmul.u32 %v761_v60, %v752_v18  ;;  %v816_v25 = vand.u32 2147483647, %v4375_v32  ;;  %v3312_v41 = vadd.s32 4294967169, %v820_v40  ;;  %v697_v43 = vsel %vm612_vm0, %v696_v31, %v672_v26 }
  0xc4   : > { %v3306_v62 = vadd.s32 4294967294, %v678_v16  ;;  %v4408_v44 = vpop.eup %3546  ;;  %v5605_v9 = vxor.u32 2147483648, %v4404_v3  ;;  %vm770_vm5 = vc.u32 %v4400_v29, %v4388_v54  ;;  %vm4435_vm8 = vcmp.le.f32.partialorder %v610_v59, 0.7853982 }
  0xc5   : > { %v5606_v58 = vxor.u32 2147483648, %v4408_v44  ;;  %v772_v60 = vsel %vm770_vm5, %v771_v6, %v4389_v21  ;;  %v826_v27 = vadd.s32 1, %v3312_v41  ;;  %v823_v57 = vand.u32 8388607, %v816_v25 }
  0xc6   : > { %vm3307_vm4 = vcmp.lt.s32.totalorder %v3306_v62, 0  ;;  %v607_v24 = vsel %vm605_vm3, %v5605_v9, %v4408_v44  ;;  %v773_v18 = vadd.s32 %v772_v60, %v768_v17  ;;  %vm702_vm3 = vweird.f32 %v3964_v8 }
  0xc7   : > { %v681_v28 = vsel %vm3307_vm4, 0, %v3306_v62  ;;  %v604_v48 = vsel %vm602_vm2, %v4404_v3, %v5606_v58  ;;  %vm827_vm6 = vcmp.gt.s32.totalorder %v826_v27, 0  ;;  %v5740_v13 = vxor.u32 2147483648, %v4193_v38 }
  0xc8   : > { %v682_v0 = vsub.s32 32, %v681_v28  ;;  %v683_v26 = vshll.u32 %v4363_v36, %v681_v28  ;;  %v686_v31 = vsub.s32 4294967266, %v681_v28  ;;  %v608_v16 = vsel %vm601_vm14, %v604_v48, %v607_v24 }
  0xc9   : > { %v609_v21 = vsel %vm599_vm13, nan, %v608_v16  ;;  %v828_v62 = vsel %vm827_vm6, %v826_v27, 0  ;;  %v774_v41 = vadd.s32 536870912, %v773_v18  ;;  %v4441_v24 = vsel %vm4435_vm8, 0, %v697_v43 }
  0xca   : > { %v684_v6 = vshrl.u32 %v666_v34, %v682_v0  ;;  %v687_v40 = vadd.s32 127, %v686_v31  ;;  %3099 = vst [vmem:[%s4179_s16 + $0x28] sm:$0xff] %v609_v21  ;;  %3113 = vst [vmem:[%s4179_s16 + $0x38] sm:$0xff] %v609_v21  ;;  %v830_v9 = vand.u32 31, %v828_v62  ;;  %v824_v48 = vor.u32 8388608, %v823_v57 }
  0xcb   : > { %v4443_v28 = vshrl.u32 %v774_v41, 30  ;;  %v4445_v0 = vshrl.u32 %v828_v62, 5  ;;  %vm715_vm14 = vcmp.lt.s32.totalorder %v3972_v37, 0  ;;  %v5744_v15 = vxor.u32 2147483648, %v4408_v44 }
  0xcc   : > { %v685_v56 = vor.u32 %v684_v6, %v683_v26  ;;  %v688_v17 = vshll.u32 %v687_v40, 23  ;;  %v831_v34 = vsub.s32 32, %v830_v9  ;;  %v833_v59 = vshll.u32 %v5655_v47, %v830_v9 }
  0xcd   : > { %v776_v31 = vshll.u32 %v4443_v28, 30  ;;  %v836_v26 = vshll.u32 %v5619_v49, %v830_v9  ;;  %v842_v6 = vshll.u32 %v5615_v53, %v830_v9  ;;  %v839_v57 = vshll.u32 %v5617_v51, %v830_v9 }
  0xce   : > { %v689_v60 = vor.u32 4788187, %v688_v17  ;;  %v692_v27 = vcvt.s32.f32 %v685_v56  ;;  %v834_v16 = vshrl.u32 %v5619_v49, %v831_v34  ;;  %v837_v43 = vshrl.u32 %v5617_v51, %v831_v34 }
  0xcf   : > { %v843_v40 = vshrl.u32 %v5666_v55, %v831_v34  ;;  %v4454_v41 = vsub.s32 %v773_v18, %v776_v31  ;;  %v840_v62 = vshrl.u32 %v5615_v53, %v831_v34  ;;  %v4461_v56 = vmul.f32 %v3840_v11, %v168_v5 }
  0xd0   : > { %v690_v21 = vand.u32 2147483647, %v689_v60  ;;  %v4464_v60 = vand.u32 3, %v4441_v24  ;;  %v845_v58 = vshll.u32 %v5666_v55, %v830_v9  ;;  %v4467_v35 = vshll.u32 %v824_v48, 8 }
  0xd1   : > { %5695 = vst [vmem:[#allocation15_spill] sm:$0xff] %v4461_v56  ;;  %v779_v18 = vsub.s32 0, %v4454_v41  ;;  %v835_v31 = vor.u32 %v834_v16, %v833_v59  ;;  %v838_v7 = vor.u32 %v837_v43, %v836_v26  ;;  %v846_v61 = vshrl.u32 %v5624_v63, %v831_v34 }
  0xd2   : > { %v693_v17 = vmul.f32 %v692_v27, %v690_v21  ;;  %v832_v39 = vshrl.u32 %v5655_v47, %v831_v34  ;;  %v844_v46 = vor.u32 %v843_v40, %v842_v6  ;;  %vm848_vm9 = vcmp.lt.s32.totalorder %v4445_v0, 1 }
  0xd3   : > { %v3309_v5 = vmin.u32 %v779_v18, %v4454_v41  ;;  %v841_v27 = vor.u32 %v840_v62, %v839_v57  ;;  %vm849_vm10 = vcmp.lt.s32.totalorder %v4445_v0, 2  ;;  %v922_v9 = vand.u32 2139095040, %v4461_v56 }
  0xd4   : > { %v694_v23 = vxor.u32 2147483648, %v693_v17  ;;  %v847_v59 = vor.u32 %v846_v61, %v845_v58  ;;  %vm850_vm11 = vcmp.lt.s32.totalorder %v4445_v0, 3  ;;  %vm851_vm12 = vcmp.lt.s32.totalorder %v4445_v0, 4 }
  0xd5   : > { %v781_v16 = vclz %v3309_v5  ;;  %v853_v26 = vsel %vm851_vm12, %v841_v27, 2102212464  ;;  %v856_v21 = vsel %vm848_vm9, %v835_v31, %v838_v7  ;;  %v852_v61 = vsel %vm848_vm9, %v832_v39, %v835_v31 }
  0xd6   : > { %v695_v48 = vsel %vm612_vm0, %v694_v23, %v693_v17  ;;  %v769_v23 = vadd.s32 %v4388_v54, %v4400_v29  ;;  %v857_v58 = vsel %vm851_vm12, %v844_v46, 920167782  ;;  %v860_v6 = vsel %vm848_vm9, %v838_v7, %v841_v27 }
  0xd7   : > { %v698_v34 = vsel %vm4435_vm8, %v3964_v8, %v695_v48  ;;  %v3310_v36 = vadd.s32 4294967294, %v781_v16  ;;  %v858_v43 = vsel %vm850_vm11, %v841_v27, %v857_v58  ;;  %v854_v40 = vsel %vm850_vm11, %v838_v7, %v853_v26 }
  0xd8   : > { %3548 = vcosq.f32 %v698_v34  ;;  %v859_v54 = vsel %vm849_vm10, %v856_v21, %v858_v43  ;;  %v861_v29 = vsel %vm851_vm12, %v847_v59, 1326507024  ;;  %v923_v57 = vshrl.u32 %v922_v9, 23 }
  0xd9   : > { %3550 = vsinq.f32 %v698_v34  ;;  %vm4506_vm0 = vcmp.le.f32.partialorder %v713_v33, 0.7853982  ;;  %vm3311_vm2 = vcmp.lt.s32.totalorder %v3310_v36, 0  ;;  %v862_v17 = vsel %vm850_vm11, %v844_v46, %v861_v29 }
  0xda   : > { %v4513_v18 = vmul.u32.u64.low %v4467_v35, %v859_v54  ;;  %v4514_v7 = vmul.u32.u64.high %v4467_v35, %v859_v54, %v4513_v18  ;;  %v784_v31 = vsel %vm3311_vm2, 0, %v3310_v36  ;;  %v799_v39 = vsub.s32 4, %v4443_v28 }
  0xdb   : > { %v863_v5 = vsel %vm849_vm10, %v860_v6, %v862_v17  ;;  %v3316_v27 = vadd.s32 4294967169, %v923_v57  ;;  %v785_v33 = vsub.s32 32, %v784_v31  ;;  %v786_v9 = vshll.u32 %v4454_v41, %v784_v31 }
  0xdc   : > { %v789_v48 = vsub.s32 4294967266, %v784_v31  ;;  %v855_v46 = vsel %vm849_vm10, %v852_v61, %v854_v40  ;;  %v4525_v59 = vmul.u32.u64.low %v4467_v35, %v863_v5  ;;  %v4526_v34 = vmul.u32.u64.high %v4467_v35, %v863_v5, %v4525_v59 }
  0xdd   : > { %v5614_v16 = vand.u32 2147483647, %v4461_v56  ;;  %v929_v26 = vadd.s32 1, %v3316_v27  ;;  %vm704_vm4 = vcmp.lt.s32.totalorder %v4464_v60, 2  ;;  %v787_v21 = vshrl.u32 %v769_v23, %v785_v33 }
  0xde   : > { %v790_v58 = vadd.s32 127, %v789_v48  ;;  %v874_v36 = vadd.s32 1, %v4514_v7  ;;  %vm705_vm5 = vcmp.eq.s32.totalorder %v4464_v60, 0  ;;  %vm708_vm6 = vcmp.eq.s32.totalorder %v4464_v60, 2 }
  0xdf   : > { %v871_v0 = vmul.u32 %v4467_v35, %v855_v46  ;;  %vm930_vm8 = vcmp.gt.s32.totalorder %v929_v26, 0  ;;  %v788_v41 = vor.u32 %v787_v21, %v786_v9  ;;  %v800_v43 = vsel %vm715_vm14, %v799_v39, %v4443_v28 }
  0xe0   : > { %v791_v61 = vshll.u32 %v790_v58, 23  ;;  %v931_v6 = vsel %vm930_vm8, %v929_v26, 0  ;;  %vm873_vm9 = vc.u32 %v4526_v34, %v4513_v18  ;;  %v926_v23 = vand.u32 8388607, %v5614_v16 }
  0xe1   : > { %v933_v54 = vand.u32 31, %v931_v6  ;;  %v154_v29 = vadd.s32 32, %v3826_v1  ;;  %v795_v31 = vcvt.s32.f32 %v788_v41  ;;  %v875_v28 = vsel %vm873_vm9, %v874_v36, %v4514_v7 }
  0xe2   : > { %v4537_v40 = vpop.eup %3548  ;;  %v792_v17 = vor.u32 4788187, %v791_v61  ;;  %v4551_v5 = vsel %vm4506_vm0, 0, %v800_v43  ;;  %v876_v27 = vadd.s32 %v875_v28, %v871_v0  ;;  %v932_v46 = vshrl.u32 %v931_v6, 5 }
  0xe3   : > { %5698 = vst [vmem:[#allocation16_spill] sm:$0xff] %v4537_v40  ;;  %v4544_v35 = vpop.eup %3550  ;;  %v5612_v57 = vxor.u32 2147483648, %v4537_v40  ;;  %v934_v33 = vsub.s32 32, %v933_v54  ;;  %v936_v7 = vshll.u32 %v5655_v47, %v933_v54  ;;  %v939_v21 = vshll.u32 %v5619_v49, %v933_v54 }
  0xe4   : > { %5699 = vst [vmem:[#allocation17_spill] sm:$0xff] %v4544_v35  ;;  %v5613_v39 = vxor.u32 2147483648, %v4544_v35  ;;  %v793_v48 = vand.u32 2147483647, %v792_v17  ;;  %v877_v26 = vadd.s32 536870912, %v876_v27  ;;  %v942_v58 = vshll.u32 %v5617_v51, %v933_v54 }
  0xe5   : > { %v710_v9 = vsel %vm708_vm6, %v5612_v57, %v4544_v35  ;;  %v937_v41 = vshrl.u32 %v5619_v49, %v934_v33  ;;  %v940_v61 = vshrl.u32 %v5617_v51, %v934_v33  ;;  %v943_v17 = vshrl.u32 %v5615_v53, %v934_v33 }
  0xe6   : > { %v707_v59 = vsel %vm705_vm5, %v4537_v40, %v5613_v39  ;;  %v796_v0 = vmul.f32 %v795_v31, %v793_v48  ;;  %v4572_v6 = vshrl.u32 %v877_v26, 30  ;;  %v945_v28 = vshll.u32 %v5615_v53, %v933_v54 }
  0xe7   : > { %v711_v36 = vsel %vm704_vm4, %v707_v59, %v710_v9  ;;  %v927_v39 = vor.u32 8388608, %v926_v23  ;;  %v946_v60 = vshrl.u32 %v5666_v55, %v934_v33  ;;  %v4580_v31 = vadd.s32 %v3828_v2, %v154_v29 }
  0xe8   : > { %v712_v43 = vsel %vm702_vm3, nan, %v711_v36  ;;  %v797_v57 = vxor.u32 2147483648, %v796_v0  ;;  %v879_v9 = vshll.u32 %v4572_v6, 30  ;;  %v935_v48 = vshrl.u32 %v5655_v47, %v934_v33 }
  0xe9   : > { %3100 = vst [vmem:[%s4179_s16 + $0x40] sm:$0xff] %v712_v43  ;;  %3114 = vst [vmem:[%s4179_s16 + $0x50] sm:$0xff] %v712_v43  ;;  %v948_v59 = vshll.u32 %v5666_v55, %v933_v54  ;;  %v949_v26 = vshrl.u32 %v5624_v63, %v934_v33  ;;  %v938_v16 = vor.u32 %v937_v41, %v936_v7  ;;  %vm951_vm10 = vcmp.lt.s32.totalorder %v932_v46, 1 }
  0xea   : > { %v798_v36 = vsel %vm715_vm14, %v797_v57, %v796_v0  ;;  %v941_v43 = vor.u32 %v940_v61, %v939_v21  ;;  %v947_v53 = vor.u32 %v946_v60, %v945_v28  ;;  %v4591_v29 = vsub.s32 %v876_v27, %v879_v9 }
  0xeb   : > { %v801_v23 = vsel %vm4506_vm0, %v3972_v37, %v798_v36  ;;  %v944_v51 = vor.u32 %v943_v17, %v942_v58  ;;  %v950_v49 = vor.u32 %v949_v26, %v948_v59  ;;  %vm954_vm11 = vcmp.lt.s32.totalorder %v932_v46, 4 }
  0xec   : > { %3552 = vcosq.f32 %v801_v23  ;;  %v169_v54 = vcvt.s32.f32 %v4580_v31  ;;  %v882_v33 = vsub.s32 0, %v4591_v29  ;;  %vm953_vm12 = vcmp.lt.s32.totalorder %v932_v46, 3 }
  0xed   : > { %3554 = vsinq.f32 %v801_v23  ;;  %v967_v57 = vshll.u32 %v927_v39, 8  ;;  %vm952_vm14 = vcmp.lt.s32.totalorder %v932_v46, 2  ;;  %v956_v7 = vsel %vm954_vm11, %v944_v51, 2102212464 }
  0xee   : > { %v959_v62 = vsel %vm951_vm10, %v938_v16, %v941_v43  ;;  %v960_v27 = vsel %vm954_vm11, %v947_v53, 920167782  ;;  %v806_v21 = vand.u32 3, %v4551_v5  ;;  %v3313_v58 = vmin.u32 %v882_v33, %v4591_v29 }
  0xef   : > { %v955_v0 = vsel %vm951_vm10, %v935_v48, %v938_v16  ;;  %v963_v41 = vsel %vm951_vm10, %v941_v43, %v944_v51  ;;  %v957_v61 = vsel %vm953_vm12, %v941_v43, %v956_v7  ;;  %v961_v17 = vsel %vm953_vm12, %v944_v51, %v960_v27 }
  0xf0   : > { %v964_v39 = vsel %vm954_vm11, %v950_v49, 1326507024  ;;  %v4608_v28 = vmul.f32 %v3838_v10, %v169_v54  ;;  %v884_v60 = vclz %v3313_v58  ;;  %v962_v9 = vsel %vm952_vm14, %v959_v62, %v961_v17 }
  0xf1   : > { %v965_v59 = vsel %vm953_vm12, %v947_v53, %v964_v39  ;;  %vm5670_vm0 = vweird.f32 %v3972_v37  ;;  %v4614_v48 = vmul.u32.u64.low %v967_v57, %v962_v9  ;;  %v4615_v26 = vmul.u32.u64.high %v967_v57, %v962_v9, %v4614_v48 }
  0xf2   : > { %5700 = vst [vmem:[#allocation18_spill] sm:$0xff] %v4608_v28  ;;  %v966_v16 = vsel %vm952_vm14, %v963_v41, %v965_v59  ;;  %v3314_v51 = vadd.s32 4294967294, %v884_v60  ;;  %v958_v49 = vsel %vm952_vm14, %v955_v0, %v957_v61  ;;  %vm807_vm2 = vcmp.lt.s32.totalorder %v806_v21, 2 }
  0xf3   : > { %v4619_v36 = vmul.u32.u64.low %v967_v57, %v966_v16  ;;  %v4620_v43 = vmul.u32.u64.high %v967_v57, %v966_v16, %v4619_v36  ;;  %vm808_vm4 = vcmp.eq.s32.totalorder %v806_v21, 0  ;;  %v1025_v23 = vand.u32 2139095040, %v4608_v28 }
  0xf4   : > { %v155_v53 = vadd.s32 40, %v3826_v1  ;;  %vm811_vm5 = vcmp.eq.s32.totalorder %v806_v21, 2  ;;  %v872_v33 = vadd.s32 %v4513_v18, %v4526_v34  ;;  %vm3315_vm6 = vcmp.lt.s32.totalorder %v3314_v51, 0 }
  0xf5   : > { %v902_v7 = vsub.s32 4, %v4572_v6  ;;  %v887_v46 = vsel %vm3315_vm6, 0, %v3314_v51  ;;  %v974_v27 = vmul.u32 %v967_v57, %v958_v49  ;;  %v977_v58 = vadd.s32 1, %v4615_v26 }
  0xf6   : > { %v4627_v62 = vpop.eup %3552  ;;  %v1026_v0 = vshrl.u32 %v1025_v23, 23  ;;  %v888_v17 = vsub.s32 32, %v887_v46  ;;  %v889_v39 = vshll.u32 %v4591_v29, %v887_v46  ;;  %v892_v60 = vsub.s32 4294967266, %v887_v46 }
  0xf7   : > { %5701 = vst [vmem:[#allocation19_spill] sm:$0xff] %v4627_v62  ;;  %v4630_v41 = vpop.eup %3554  ;;  %v5621_v61 = vxor.u32 2147483648, %v4627_v62  ;;  %vm976_vm8 = vc.u32 %v4620_v43, %v4614_v48  ;;  %v5623_v34 = vand.u32 2147483647, %v4608_v28  ;;  %vm818_vm9 = vcmp.lt.s32.totalorder %v4375_v32, 0 }
  0xf8   : > { %5702 = vst [vmem:[#allocation20_spill] sm:$0xff] %v4630_v41  ;;  %v5622_v18 = vxor.u32 2147483648, %v4630_v41  ;;  %v3320_v9 = vadd.s32 4294967169, %v1026_v0  ;;  %v890_v59 = vshrl.u32 %v872_v33, %v888_v17  ;;  %v893_v16 = vadd.s32 127, %v892_v60 }
  0xf9   : > { %v813_v57 = vsel %vm811_vm5, %v5621_v61, %v4630_v41  ;;  %v978_v29 = vsel %vm976_vm8, %v977_v58, %v4615_v26  ;;  %v903_v33 = vsel %vm818_vm9, %v902_v7, %v4572_v6  ;;  %v1029_v17 = vand.u32 8388607, %v5623_v34 }
  0xfa   : > { %v810_v51 = vsel %vm808_vm4, %v4627_v62, %v5622_v18  ;;  %v979_v49 = vadd.s32 %v978_v29, %v974_v27  ;;  %v1032_v36 = vadd.s32 1, %v3320_v9  ;;  %v891_v46 = vor.u32 %v890_v59, %v889_v39 }
  0xfb   : > { %v814_v23 = vsel %vm807_vm2, %v810_v51, %v813_v57  ;;  %v894_v0 = vshll.u32 %v893_v16, 23  ;;  %v4659_v39 = vadd.s32 %v3828_v2, %v155_v53  ;;  %vm4663_vm11 = vcmp.le.f32.partialorder %v816_v25, 0.7853982 }
  0xfc   : > { %v815_v26 = vsel %vm5670_vm0, nan, %v814_v23  ;;  %v980_v58 = vadd.s32 536870912, %v979_v49  ;;  %vm1033_vm10 = vcmp.gt.s32.totalorder %v1032_v36, 0  ;;  %v898_v60 = vcvt.s32.f32 %v891_v46 }
  0xfd   : > { %3101 = vst [vmem:[%s4179_s16 + $0x48] sm:$0xff] %v815_v26  ;;  %3115 = vst [vmem:[%s4179_s16 + $0x58] sm:$0xff] %v815_v26  ;;  %v895_v27 = vor.u32 4788187, %v894_v0  ;;  %v1034_v21 = vsel %vm1033_vm10, %v1032_v36, 0  ;;  %v4671_v59 = vsel %vm4663_vm11, 0, %v903_v33  ;;  %v4676_v16 = vmul.f32 %v3840_v11, %v169_v54 }
  0xfe   : > { %v4667_v7 = vshrl.u32 %v980_v58, 30  ;;  %v1036_v9 = vand.u32 31, %v1034_v21  ;;  %5705 = vst [vmem:[#allocation21_spill] sm:$0xff] %v4671_v59  ;;  %v4679_v53 = vand.u32 3, %v4671_v59  ;;  %v1030_v29 = vor.u32 8388608, %v1029_v17 }
  0xff   : > { %v896_v57 = vand.u32 2147483647, %v895_v27  ;;  %5706 = vst [vmem:[#allocation22_spill] sm:$0xff] %v4676_v16  ;;  %v5707_v31 = vmov 2475754826   ;;  %v1035_v46 = vshrl.u32 %v1034_v21, 5  ;;  %vm5669_vm8 = vweird.f32 %v4375_v32 }
 0x100   : > { %v982_v25 = vshll.u32 %v4667_v7, 30  ;;  %v1037_v51 = vsub.s32 32, %v1036_v9  ;;  %v1039_v23 = vshll.u32 %v5655_v47, %v1036_v9  ;;  %v1042_v54 = vshll.u32 %v5707_v31, %v1036_v9 }
 0x101   : > { %v899_v36 = vmul.f32 %v898_v60, %v896_v57  ;;  %v5708_v58 = vmov 2131351028   ;;  %v5709_v17 = vmov 2102212464   ;;  %v1051_v37 = vshll.u32 %v5666_v55, %v1036_v9 }
 0x102   : > { %v4685_v33 = vsub.s32 %v979_v49, %v982_v25  ;;  %v1040_v26 = vshrl.u32 %v5707_v31, %v1037_v51  ;;  %v1045_v27 = vshll.u32 %v5708_v58, %v1036_v9  ;;  %v1043_v18 = vshrl.u32 %v5708_v58, %v1037_v51 }
 0x103   : > { %v900_v61 = vxor.u32 2147483648, %v899_v36  ;;  %v1046_v34 = vshrl.u32 %v5709_v17, %v1037_v51  ;;  %v1048_v60 = vshll.u32 %v5709_v17, %v1036_v9  ;;  %v1049_v0 = vshrl.u32 %v5666_v55, %v1037_v51 }
 0x104   : > { %v985_v57 = vsub.s32 0, %v4685_v33  ;;  %v4695_v49 = vshll.u32 %v1030_v29, 8  ;;  %v1038_v63 = vshrl.u32 %v5655_v47, %v1037_v51  ;;  %v1128_v62 = vand.u32 2139095040, %v4676_v16 }
 0x105   : > { %v901_v25 = vsel %vm818_vm9, %v900_v61, %v899_v36  ;;  %v1041_v21 = vor.u32 %v1040_v26, %v1039_v23  ;;  %v1044_v40 = vor.u32 %v1043_v18, %v1042_v54  ;;  %v1047_v29 = vor.u32 %v1046_v34, %v1045_v27 }
 0x106   : > { %v904_v41 = vsel %vm4663_vm11, %v4375_v32, %v901_v25  ;;  %v3317_v8 = vmin.u32 %v985_v57, %v4685_v33  ;;  %v1050_v35 = vor.u32 %v1049_v0, %v1048_v60  ;;  %v5710_v59 = vmov 1326507024  }
 0x107   : > { %3556 = vcosq.f32 %v904_v41  ;;  %v1052_v45 = vshrl.u32 %v5710_v59, %v1037_v51  ;;  %vm1054_vm12 = vcmp.lt.s32.totalorder %v1035_v46, 1  ;;  %vm1055_vm14 = vcmp.lt.s32.totalorder %v1035_v46, 2 }
 0x108   : > { %3558 = vsinq.f32 %v904_v41  ;;  %v987_v61 = vclz %v3317_v8  ;;  %vm1056_vm2 = vcmp.lt.s32.totalorder %v1035_v46, 3  ;;  %vm1057_vm4 = vcmp.lt.s32.totalorder %v1035_v46, 4 }
 0x109   : > { %v1053_v9 = vor.u32 %v1052_v45, %v1051_v37  ;;  %v1058_v36 = vsel %vm1054_vm12, %v1038_v63, %v1041_v21  ;;  %vm921_vm5 = vcmp.lt.s32.totalorder %v4461_v56, 0  ;;  %v1059_v25 = vsel %vm1057_vm4, %v1047_v29, 2102212464 }
 0x10a   : > { %v3318_v6 = vadd.s32 4294967294, %v987_v61  ;;  %v1062_v57 = vsel %vm1054_vm12, %v1041_v21, %v1044_v40  ;;  %v1063_v23 = vsel %vm1057_vm4, %v1050_v35, 920167782  ;;  %vm910_vm6 = vcmp.lt.s32.totalorder %v4679_v53, 2 }
 0x10b   : > { %v1060_v18 = vsel %vm1056_vm2, %v1044_v40, %v1059_v25  ;;  %v1064_v34 = vsel %vm1056_vm2, %v1047_v29, %v1063_v23  ;;  %v1066_v41 = vsel %vm1054_vm12, %v1044_v40, %v1047_v29  ;;  %v1067_v8 = vsel %vm1057_vm4, %v1053_v9, 1326507024 }
 0x10c   : > { %v975_v45 = vadd.s32 %v4614_v48, %v4620_v43  ;;  %vm3319_vm9 = vcmp.lt.s32.totalorder %v3318_v6, 0  ;;  %v1065_v63 = vsel %vm1055_vm14, %v1062_v57, %v1064_v34  ;;  %v1068_v37 = vsel %vm1056_vm2, %v1050_v35, %v1067_v8 }
 0x10d   : > { %v990_v51 = vsel %vm3319_vm9, 0, %v3318_v6  ;;  %v1069_v0 = vsel %vm1055_vm14, %v1066_v41, %v1068_v37  ;;  %v4718_v26 = vmul.u32.u64.low %v4695_v49, %v1065_v63  ;;  %v4719_v54 = vmul.u32.u64.high %v4695_v49, %v1065_v63, %v4718_v26 }
 0x10e   : > { %v991_v40 = vsub.s32 32, %v990_v51  ;;  %v992_v27 = vshll.u32 %v4685_v33, %v990_v51  ;;  %v995_v60 = vsub.s32 4294967266, %v990_v51  ;;  %v1061_v21 = vsel %vm1055_vm14, %v1058_v36, %v1060_v18 }
 0x10f   : > { %v1005_v48 = vsub.s32 4, %v4667_v7  ;;  %v4726_v43 = vmul.u32.u64.low %v4695_v49, %v1069_v0  ;;  %v4727_v29 = vmul.u32.u64.high %v4695_v49, %v1069_v0, %v4726_v43  ;;  %v1129_v35 = vshrl.u32 %v1128_v62, 23 }
 0x110   : > { %vm911_vm10 = vcmp.eq.s32.totalorder %v4679_v53, 0  ;;  %vm914_vm11 = vcmp.eq.s32.totalorder %v4679_v53, 2  ;;  %v993_v61 = vshrl.u32 %v975_v45, %v991_v40  ;;  %v996_v9 = vadd.s32 127, %v995_v60 }
 0x111   : > { %v4731_v6 = vpop.eup %3556  ;;  %v1077_v33 = vmul.u32 %v4695_v49, %v1061_v21  ;;  %v1080_v46 = vadd.s32 1, %v4719_v54  ;;  %v3324_v36 = vadd.s32 4294967169, %v1129_v35  ;;  %v5712_v25 = vcvt.s32.f32 %v4659_v39 }
 0x112   : > { %5711 = vst [vmem:[#allocation23_spill] sm:$0xff] %v4731_v6  ;;  %v4740_v23 = vpop.eup %3558  ;;  %v5638_v62 = vxor.u32 2147483648, %v4731_v6  ;;  %v994_v18 = vor.u32 %v993_v61, %v992_v27  ;;  %v997_v34 = vshll.u32 %v996_v9, 23  ;;  %v5715_v41 = vand.u32 2147483647, %v4676_v16 }
 0x113   : > { %v4738_v57 = vmul.f32 %v3838_v10, %v5712_v25  ;;  %5714 = vst [vmem:[#allocation25_spill] sm:$0xff] %v4740_v23  ;;  %v5639_v45 = vxor.u32 2147483648, %v4740_v23  ;;  %v1006_v49 = vsel %vm921_vm5, %v1005_v48, %v4667_v7  ;;  %vm1079_vm12 = vc.u32 %v4727_v29, %v4718_v26 }
 0x114   : > { %v1132_v8 = vand.u32 8388607, %v5715_v41  ;;  %v1135_v63 = vadd.s32 1, %v3324_v36  ;;  %v916_v37 = vsel %vm914_vm11, %v5638_v62, %v4740_v23  ;;  %v998_v51 = vor.u32 4788187, %v997_v34 }
 0x115   : > { %5713 = vst [vmem:[#allocation24_spill] sm:$0xff] %v4738_v57  ;;  %v1001_v0 = vcvt.s32.f32 %v994_v18  ;;  %v1081_v40 = vsel %vm1079_vm12, %v1080_v46, %v4719_v54  ;;  %v913_v7 = vsel %vm911_vm10, %v4731_v6, %v5639_v45  ;;  %v1231_v60 = vand.u32 2139095040, %v4738_v57 }
 0x116   : > { %v1082_v27 = vadd.s32 %v1081_v40, %v1077_v33  ;;  %vm1136_vm14 = vcmp.gt.s32.totalorder %v1135_v63, 0  ;;  %v917_v21 = vsel %vm910_vm6, %v913_v7, %v916_v37  ;;  %v5716_v48 = vand.u32 2147483647, %v4461_v56 }
 0x117   : > { %v999_v54 = vand.u32 2147483647, %v998_v51  ;;  %v1137_v35 = vsel %vm1136_vm14, %v1135_v63, 0  ;;  %v918_v61 = vsel %vm5669_vm8, nan, %v917_v21  ;;  %v1133_v18 = vor.u32 8388608, %v1132_v8 }
 0x118   : > { %vm4767_vm2 = vcmp.le.f32.partialorder %v5716_v48, 0.7853982  ;;  %v1083_v33 = vadd.s32 536870912, %v1082_v27  ;;  %v1139_v46 = vand.u32 31, %v1137_v35  ;;  %3102 = vst [vmem:[%s4179_s16 + $0x60] sm:$0xff] %v918_v61  ;;  %3116 = vst [vmem:[%s4179_s16 + $0x70] sm:$0xff] %v918_v61  ;;  %vm5665_vm11 = vweird.f32 %v4461_v56 }
 0x119   : > { %v4775_v9 = vsel %vm4767_vm2, 0, %v1006_v49  ;;  %v1002_v53 = vmul.f32 %v1001_v0, %v999_v54  ;;  %v1232_v41 = vshrl.u32 %v1231_v60, 23  ;;  %v1138_v37 = vshrl.u32 %v1137_v35, 5 }
 0x11a   : > { %5719 = vst [vmem:[#allocation26_spill] sm:$0xff] %v4775_v9  ;;  %v4780_v36 = vand.u32 3, %v4775_v9  ;;  %v4782_v25 = vshrl.u32 %v1083_v33, 30  ;;  %v1140_v34 = vsub.s32 32, %v1139_v46  ;;  %v1142_v51 = vshll.u32 %v5655_v47, %v1139_v46 }
 0x11b   : > { %v1003_v63 = vxor.u32 2147483648, %v1002_v53  ;;  %v1145_v49 = vshll.u32 %v5707_v31, %v1139_v46  ;;  %v1148_v0 = vshll.u32 %v5708_v58, %v1139_v46  ;;  %v1151_v21 = vshll.u32 %v5709_v17, %v1139_v46 }
 0x11c   : > { %v1085_v40 = vshll.u32 %v4782_v25, 30  ;;  %v1143_v7 = vshrl.u32 %v5707_v31, %v1140_v34  ;;  %v1146_v8 = vshrl.u32 %v5708_v58, %v1140_v34  ;;  %v1149_v60 = vshrl.u32 %v5709_v17, %v1140_v34 }
 0x11d   : > { %v1004_v48 = vsel %vm921_vm5, %v1003_v63, %v1002_v53  ;;  %v1152_v54 = vshrl.u32 %v5666_v55, %v1140_v34  ;;  %v1154_v33 = vshll.u32 %v5666_v55, %v1139_v46  ;;  %v5648_v62 = vand.u32 2147483647, %v4738_v57 }
 0x11e   : > { %v1007_v35 = vsel %vm4767_vm2, %v4461_v56, %v1004_v48  ;;  %v4798_v61 = vsub.s32 %v1082_v27, %v1085_v40  ;;  %v1141_v45 = vshrl.u32 %v5655_v47, %v1140_v34  ;;  %v1144_v53 = vor.u32 %v1143_v7, %v1142_v51 }
 0x11f   : > { %3560 = vcosq.f32 %v1007_v35  ;;  %v1147_v63 = vor.u32 %v1146_v8, %v1145_v49  ;;  %v1150_v6 = vor.u32 %v1149_v60, %v1148_v0  ;;  %v1153_v23 = vor.u32 %v1152_v54, %v1151_v21 }
 0x120   : > { %3562 = vsinq.f32 %v1007_v35  ;;  %v1088_v32 = vsub.s32 0, %v4798_v61  ;;  %v1155_v9 = vshrl.u32 %v5710_v59, %v1140_v34  ;;  %vm1157_vm4 = vcmp.lt.s32.totalorder %v1138_v37, 1 }
 0x121   : > { %v1173_v43 = vshll.u32 %v1133_v18, 8  ;;  %v3328_v27 = vadd.s32 4294967169, %v1232_v41  ;;  %v1078_v46 = vadd.s32 %v4718_v26, %v4727_v29  ;;  %vm1158_vm5 = vcmp.lt.s32.totalorder %v1138_v37, 2 }
 0x122   : > { %v3321_v40 = vmin.u32 %v1088_v32, %v4798_v61  ;;  %vm1159_vm6 = vcmp.lt.s32.totalorder %v1138_v37, 3  ;;  %vm1013_vm9 = vcmp.lt.s32.totalorder %v4780_v36, 2  ;;  %v1156_v51 = vor.u32 %v1155_v9, %v1154_v33 }
 0x123   : > { %vm1160_vm10 = vcmp.lt.s32.totalorder %v1138_v37, 4  ;;  %v1161_v49 = vsel %vm1157_vm4, %v1141_v45, %v1144_v53  ;;  %v1165_v7 = vsel %vm1157_vm4, %v1144_v53, %v1147_v63  ;;  %v1169_v0 = vsel %vm1157_vm4, %v1147_v63, %v1150_v6 }
 0x124   : > { %v1090_v34 = vclz %v3321_v40  ;;  %v1162_v18 = vsel %vm1160_vm10, %v1150_v6, 2102212464  ;;  %v1166_v41 = vsel %vm1160_vm10, %v1153_v23, 920167782  ;;  %v1170_v29 = vsel %vm1160_vm10, %v1156_v51, 1326507024 }
 0x125   : > { %v1163_v26 = vsel %vm1159_vm6, %v1147_v63, %v1162_v18  ;;  %v1167_v32 = vsel %vm1159_vm6, %v1150_v6, %v1166_v41  ;;  %v1238_v21 = vadd.s32 1, %v3328_v27  ;;  %v1171_v45 = vsel %vm1159_vm6, %v1153_v23, %v1170_v29 }
 0x126   : > { %v3322_v48 = vadd.s32 4294967294, %v1090_v34  ;;  %v1168_v9 = vsel %vm1158_vm5, %v1165_v7, %v1167_v32  ;;  %v4819_v8 = vand.u32 8388607, %v5648_v62  ;;  %v1164_v60 = vsel %vm1158_vm5, %v1161_v49, %v1163_v26 }
 0x127   : > { %v1172_v54 = vsel %vm1158_vm5, %v1169_v0, %v1171_v45  ;;  %v4823_v35 = vmul.u32.u64.low %v1173_v43, %v1168_v9  ;;  %v4824_v33 = vmul.u32.u64.high %v1173_v43, %v1168_v9, %v4823_v35  ;;  %vm1239_vm14 = vcmp.gt.s32.totalorder %v1238_v21, 0 }
 0x128   : > { %vm3323_vm12 = vcmp.lt.s32.totalorder %v3322_v48, 0  ;;  %v4827_v6 = vmul.u32.u64.low %v1173_v43, %v1172_v54  ;;  %v4828_v53 = vmul.u32.u64.high %v1173_v43, %v1172_v54, %v4827_v6  ;;  %vm1014_vm2 = vcmp.eq.s32.totalorder %v4780_v36, 0 }
 0x129   : > { %v4830_v63 = vpop.eup %3560  ;;  %vm1017_vm4 = vcmp.eq.s32.totalorder %v4780_v36, 2  ;;  %v1093_v23 = vsel %vm3323_vm12, 0, %v3322_v48  ;;  %v1240_v27 = vsel %vm1239_vm14, %v1238_v21, 0  ;;  %v1180_v18 = vmul.u32 %v1173_v43, %v1164_v60 }
 0x12a   : > { %v4834_v40 = vpop.eup %3562  ;;  %v5646_v37 = vxor.u32 2147483648, %v4830_v63  ;;  %v1094_v51 = vsub.s32 32, %v1093_v23  ;;  %v1095_v49 = vshll.u32 %v4798_v61, %v1093_v23  ;;  %v1098_v7 = vsub.s32 4294967266, %v1093_v23 }
 0x12b   : > { %v5647_v34 = vxor.u32 2147483648, %v4834_v40  ;;  %v1183_v41 = vadd.s32 1, %v4824_v33  ;;  %v1242_v0 = vand.u32 31, %v1240_v27  ;;  %vm1024_vm5 = vcmp.lt.s32.totalorder %v4608_v28, 0 }
 0x12c   : > { %v1019_v26 = vsel %vm1017_vm4, %v5646_v37, %v4834_v40  ;;  %v1096_v32 = vshrl.u32 %v1078_v46, %v1094_v51  ;;  %v1099_v29 = vadd.s32 127, %v1098_v7  ;;  %v1236_v21 = vor.u32 8388608, %v4819_v8 }
 0x12d   : > { %v1016_v61 = vsel %vm1014_vm2, %v4830_v63, %v5647_v34  ;;  %vm1182_vm6 = vc.u32 %v4828_v53, %v4823_v35  ;;  %v1243_v43 = vsub.s32 32, %v1242_v0  ;;  %v1245_v48 = vshll.u32 %v5655_v47, %v1242_v0 }
 0x12e   : > { %v1020_v46 = vsel %vm1013_vm9, %v1016_v61, %v1019_v26  ;;  %v5720_v9 = vand.u32 2147483647, %v4608_v28  ;;  %v1097_v8 = vor.u32 %v1096_v32, %v1095_v49  ;;  %v1100_v60 = vshll.u32 %v1099_v29, 23 }
 0x12f   : > { %v1184_v54 = vsel %vm1182_vm6, %v1183_v41, %v4824_v33  ;;  %v1021_v6 = vsel %vm5665_vm11, nan, %v1020_v46  ;;  %v1241_v51 = vshrl.u32 %v1240_v27, 5  ;;  %v1246_v7 = vshrl.u32 %v5707_v31, %v1243_v43 }
 0x130   : > { %vm4857_vm10 = vcmp.le.f32.partialorder %v5720_v9, 0.7853982  ;;  %v1185_v23 = vadd.s32 %v1184_v54, %v1180_v18  ;;  %3103 = vst [vmem:[%s4179_s16 + $0x68] sm:$0xff] %v1021_v6  ;;  %3117 = vst [vmem:[%s4179_s16 + $0x78] sm:$0xff] %v1021_v6  ;;  %v1101_v36 = vor.u32 4788187, %v1100_v60  ;;  %v1104_v26 = vcvt.s32.f32 %v1097_v8 }
 0x131   : > { %v1248_v61 = vshll.u32 %v5707_v31, %v1242_v0  ;;  %v1249_v9 = vshrl.u32 %v5708_v58, %v1243_v43  ;;  %v1108_v49 = vsub.s32 4, %v4782_v25  ;;  %v1251_v33 = vshll.u32 %v5708_v58, %v1242_v0 }
 0x132   : > { %v1186_v32 = vadd.s32 536870912, %v1185_v23  ;;  %v1252_v41 = vshrl.u32 %v5709_v17, %v1243_v43  ;;  %v1102_v29 = vand.u32 2147483647, %v1101_v36  ;;  %v1247_v18 = vor.u32 %v1246_v7, %v1245_v48 }
 0x133   : > { %v1254_v27 = vshll.u32 %v5709_v17, %v1242_v0  ;;  %v1255_v46 = vshrl.u32 %v5666_v55, %v1243_v43  ;;  %v1250_v8 = vor.u32 %v1249_v9, %v1248_v61  ;;  %v1257_v60 = vshll.u32 %v5666_v55, %v1242_v0 }
 0x134   : > { %v4874_v54 = vshrl.u32 %v1186_v32, 30  ;;  %v1258_v6 = vshrl.u32 %v5710_v59, %v1243_v43  ;;  %v1105_v37 = vmul.f32 %v1104_v26, %v1102_v29  ;;  %v1253_v34 = vor.u32 %v1252_v41, %v1251_v33 }
 0x135   : > { %v1256_v62 = vor.u32 %v1255_v46, %v1254_v27  ;;  %vm1260_vm9 = vcmp.lt.s32.totalorder %v1241_v51, 1  ;;  %v1109_v36 = vsel %vm1024_vm5, %v1108_v49, %v4782_v25  ;;  %v1244_v7 = vshrl.u32 %v5655_v47, %v1243_v43 }
 0x136   : > { %v1188_v48 = vshll.u32 %v4874_v54, 30  ;;  %vm1262_vm12 = vcmp.lt.s32.totalorder %v1241_v51, 3  ;;  %v1106_v32 = vxor.u32 2147483648, %v1105_v37  ;;  %v1259_v56 = vor.u32 %v1258_v6, %v1257_v60 }
 0x137   : > { %vm1261_vm14 = vcmp.lt.s32.totalorder %v1241_v51, 2  ;;  %vm1263_vm2 = vcmp.lt.s32.totalorder %v1241_v51, 4  ;;  %v1268_v61 = vsel %vm1260_vm9, %v1247_v18, %v1250_v8  ;;  %v1276_v33 = vshll.u32 %v1236_v21, 8 }
 0x138   : > { %v4883_v0 = vsub.s32 %v1185_v23, %v1188_v48  ;;  %v1265_v26 = vsel %vm1263_vm2, %v1253_v34, 2102212464  ;;  %v1269_v9 = vsel %vm1263_vm2, %v1256_v62, 920167782  ;;  %v1107_v25 = vsel %vm1024_vm5, %v1106_v32, %v1105_v37 }
 0x139   : > { %v1270_v49 = vsel %vm1262_vm12, %v1253_v34, %v1269_v9  ;;  %v5723_v43 = vcvt.s32.f32 %v4659_v39  ;;  %v1110_v23 = vsel %vm4857_vm10, %v4608_v28, %v1107_v25  ;;  %v1264_v27 = vsel %vm1260_vm9, %v1244_v7, %v1247_v18 }
 0x13a   : > { %v1191_v29 = vsub.s32 0, %v4883_v0  ;;  %v1266_v46 = vsel %vm1262_vm12, %v1250_v8, %v1265_v26  ;;  %3564 = vcosq.f32 %v1110_v23  ;;  %v1271_v37 = vsel %vm1261_vm14, %v1268_v61, %v1270_v49 }
 0x13b   : > { %v4894_v41 = vmul.f32 %v3840_v11, %v5723_v43  ;;  %v1272_v21 = vsel %vm1260_vm9, %v1250_v8, %v1253_v34  ;;  %v1273_v39 = vsel %vm1263_vm2, %v1259_v56, 1326507024  ;;  %3566 = vsinq.f32 %v1110_v23 }
 0x13c   : > { %v3325_v60 = vmin.u32 %v1191_v29, %v4883_v0  ;;  %v4908_v6 = vsel %vm4857_vm10, 0, %v1109_v36  ;;  %v1274_v48 = vsel %vm1262_vm12, %v1256_v62, %v1273_v39  ;;  %v1267_v34 = vsel %vm1261_vm14, %v1264_v27, %v1266_v46 }
 0x13d   : > { %v4911_v32 = vmul.u32.u64.low %v1276_v33, %v1271_v37  ;;  %v4912_v18 = vmul.u32.u64.high %v1276_v33, %v1271_v37, %v4911_v32  ;;  %v1115_v7 = vand.u32 3, %v4908_v6  ;;  %v1275_v56 = vsel %vm1261_vm14, %v1272_v21, %v1274_v48 }
 0x13e   : > { %v1193_v26 = vclz %v3325_v60  ;;  %v4918_v8 = vmul.u32.u64.low %v1276_v33, %v1275_v56  ;;  %v4919_v61 = vmul.u32.u64.high %v1276_v33, %v1275_v56, %v4918_v8  ;;  %v1334_v45 = vand.u32 2139095040, %v4894_v41 }
 0x13f   : > { %vm5664_vm4 = vweird.f32 %v4608_v28  ;;  %v156_v62 = vadd.s32 48, %v3826_v1  ;;  %vm1127_vm5 = vcmp.lt.s32.totalorder %v4676_v16, 0  ;;  %v1283_v9 = vmul.u32 %v1276_v33, %v1267_v34 }
 0x140   : > { %v3326_v36 = vadd.s32 4294967294, %v1193_v26  ;;  %v1286_v25 = vadd.s32 1, %v4912_v18  ;;  %v1335_v49 = vshrl.u32 %v1334_v45, 23  ;;  %vm1116_vm6 = vcmp.lt.s32.totalorder %v1115_v7, 2 }
 0x141   : > { %v1181_v51 = vadd.s32 %v4823_v35, %v4828_v53  ;;  %v1211_v43 = vsub.s32 4, %v4874_v54  ;;  %vm1285_vm9 = vc.u32 %v4919_v61, %v4911_v32  ;;  %v5652_v29 = vand.u32 2147483647, %v4894_v41 }
 0x142   : > { %vm3327_vm10 = vcmp.lt.s32.totalorder %v3326_v36, 0  ;;  %v3332_v1 = vadd.s32 4294967169, %v1335_v49  ;;  %v1287_v37 = vsel %vm1285_vm9, %v1286_v25, %v4912_v18  ;;  %vm1117_vm12 = vcmp.eq.s32.totalorder %v1115_v7, 0 }
 0x143   : > { %v1196_v23 = vsel %vm3327_vm10, 0, %v3326_v36  ;;  %vm1120_vm14 = vcmp.eq.s32.totalorder %v1115_v7, 2  ;;  %v1288_v35 = vadd.s32 %v1287_v37, %v1283_v9  ;;  %v1212_v34 = vsel %vm1127_vm5, %v1211_v43, %v4874_v54 }
 0x144   : > { %v1197_v27 = vsub.s32 32, %v1196_v23  ;;  %v1198_v33 = vshll.u32 %v4883_v0, %v1196_v23  ;;  %v1201_v46 = vsub.s32 4294967266, %v1196_v23  ;;  %v4934_v21 = vpop.eup %3564  ;;  %v1341_v53 = vadd.s32 1, %v3332_v1 }
 0x145   : > { %5724 = vst [vmem:[#allocation27_spill] sm:$0xff] %v4934_v21  ;;  %v4936_v39 = vpop.eup %3566  ;;  %v5650_v60 = vxor.u32 2147483648, %v4934_v21  ;;  %v1289_v56 = vadd.s32 536870912, %v1288_v35  ;;  %v1338_v18 = vand.u32 8388607, %v5652_v29 }
 0x146   : > { %v1199_v48 = vshrl.u32 %v1181_v51, %v1197_v27  ;;  %v1202_v26 = vadd.s32 127, %v1201_v46  ;;  %v5651_v0 = vxor.u32 2147483648, %v4936_v39  ;;  %vm1342_vm2 = vcmp.gt.s32.totalorder %v1341_v53, 0 }
 0x147   : > { %v1122_v8 = vsel %vm1120_vm14, %v5650_v60, %v4936_v39  ;;  %v1343_v9 = vsel %vm1342_vm2, %v1341_v53, 0  ;;  %v5725_v25 = vand.u32 2147483647, %v4676_v16  ;;  %v4958_v51 = vshrl.u32 %v1289_v56, 30 }
 0x148   : > { %v1200_v45 = vor.u32 %v1199_v48, %v1198_v33  ;;  %v1203_v36 = vshll.u32 %v1202_v26, 23  ;;  %v1119_v54 = vsel %vm1117_vm12, %v4934_v21, %v5651_v0  ;;  %v1345_v43 = vand.u32 31, %v1343_v9 }
 0x149   : > { %vm4954_vm10 = vcmp.le.f32.partialorder %v5725_v25, 0.7853982  ;;  %v1123_v23 = vsel %vm1116_vm6, %v1119_v54, %v1122_v8  ;;  %v1291_v37 = vshll.u32 %v4958_v51, 30  ;;  %v1339_v53 = vor.u32 8388608, %v1338_v18 }
 0x14a   : > { %v1204_v1 = vor.u32 4788187, %v1203_v36  ;;  %v1207_v27 = vcvt.s32.f32 %v1200_v45  ;;  %v4963_v33 = vsel %vm4954_vm10, 0, %v1212_v34  ;;  %v1124_v46 = vsel %vm5664_vm4, nan, %v1123_v23 }
 0x14b   : > { %5728 = vst [vmem:[#allocation28_spill] sm:$0xff] %v4963_v33  ;;  %v1346_v48 = vsub.s32 32, %v1345_v43  ;;  %3104 = vst [vmem:[%s4179_s16 + $0x80] sm:$0xff] %v1124_v46  ;;  %v4971_v56 = vand.u32 3, %v4963_v33  ;;  %v1348_v7 = vshll.u32 %v5655_v47, %v1345_v43  ;;  %v4975_v8 = vadd.s32 %v3828_v2, %v156_v62 }
 0x14c   : > { %3118 = vst [vmem:[%s4179_s16 + $0x90] sm:$0xff] %v1124_v46  ;;  %v1205_v26 = vand.u32 2147483647, %v1204_v1  ;;  %v4977_v34 = vsub.s32 %v1288_v35, %v1291_v37  ;;  %v1351_v36 = vshll.u32 %v5707_v31, %v1345_v43  ;;  %v1354_v18 = vshll.u32 %v5708_v58, %v1345_v43 }
 0x14d   : > { %v1349_v45 = vshrl.u32 %v5707_v31, %v1346_v48  ;;  %v1284_v25 = vadd.s32 %v4911_v32, %v4919_v61  ;;  %v1352_v23 = vshrl.u32 %v5708_v58, %v1346_v48  ;;  %v1355_v1 = vshrl.u32 %v5709_v17, %v1346_v48 }
 0x14e   : > { %v1208_v54 = vmul.f32 %v1207_v27, %v1205_v26  ;;  %v1294_v46 = vsub.s32 0, %v4977_v34  ;;  %v1344_v2 = vshrl.u32 %v1343_v9, 5  ;;  %v1357_v62 = vshll.u32 %v5709_v17, %v1345_v43 }
 0x14f   : > { %v4988_v35 = vshll.u32 %v1339_v53, 8  ;;  %v1347_v60 = vshrl.u32 %v5655_v47, %v1346_v48  ;;  %v1358_v0 = vshrl.u32 %v5666_v55, %v1346_v48  ;;  %v171_v27 = vcvt.s32.f32 %v4975_v8 }
 0x150   : > { %v1209_v37 = vxor.u32 2147483648, %v1208_v54  ;;  %v3329_v32 = vmin.u32 %v1294_v46, %v4977_v34  ;;  %v1350_v61 = vor.u32 %v1349_v45, %v1348_v7  ;;  %v1353_v26 = vor.u32 %v1352_v23, %v1351_v36 }
 0x151   : > { %v1356_v29 = vor.u32 %v1355_v1, %v1354_v18  ;;  %v1359_v9 = vor.u32 %v1358_v0, %v1357_v62  ;;  %v1360_v33 = vshll.u32 %v5666_v55, %v1345_v43  ;;  %v1361_v53 = vshrl.u32 %v5710_v59, %v1346_v48 }
 0x152   : > { %v1210_v28 = vsel %vm1127_vm5, %v1209_v37, %v1208_v54  ;;  %v1296_v21 = vclz %v3329_v32  ;;  %vm1363_vm6 = vcmp.lt.s32.totalorder %v1344_v2, 1  ;;  %vm1364_vm9 = vcmp.lt.s32.totalorder %v1344_v2, 2 }
 0x153   : > { %v1213_v47 = vsel %vm4954_vm10, %v4676_v16, %v1210_v28  ;;  %v1362_v46 = vor.u32 %v1361_v53, %v1360_v33  ;;  %vm1365_vm12 = vcmp.lt.s32.totalorder %v1344_v2, 3  ;;  %vm1366_vm14 = vcmp.lt.s32.totalorder %v1344_v2, 4 }
 0x154   : > { %3568 = vcosq.f32 %v1213_v47  ;;  %v3330_v7 = vadd.s32 4294967294, %v1296_v21  ;;  %v1367_v45 = vsel %vm1363_vm6, %v1347_v60, %v1350_v61  ;;  %v1368_v36 = vsel %vm1366_vm14, %v1356_v29, 2102212464 }
 0x155   : > { %3570 = vsinq.f32 %v1213_v47  ;;  %v1369_v0 = vsel %vm1365_vm12, %v1353_v26, %v1368_v36  ;;  %v1371_v43 = vsel %vm1363_vm6, %v1350_v61, %v1353_v26  ;;  %v1372_v18 = vsel %vm1366_vm14, %v1359_v9, 920167782 }
 0x156   : > { %v1375_v48 = vsel %vm1363_vm6, %v1353_v26, %v1356_v29  ;;  %vm3331_vm5 = vcmp.lt.s32.totalorder %v3330_v7, 0  ;;  %v1373_v49 = vsel %vm1365_vm12, %v1356_v29, %v1372_v18  ;;  %v1376_v28 = vsel %vm1366_vm14, %v1362_v46, 1326507024 }
 0x157   : > { %v5006_v54 = vmul.f32 %v3838_v10, %v171_v27  ;;  %v1299_v33 = vsel %vm3331_vm5, 0, %v3330_v7  ;;  %v1370_v47 = vsel %vm1364_vm9, %v1367_v45, %v1369_v0  ;;  %v1374_v21 = vsel %vm1364_vm9, %v1371_v43, %v1373_v49 }
 0x158   : > { %v1377_v60 = vsel %vm1365_vm12, %v1359_v9, %v1376_v28  ;;  %vm5663_vm2 = vweird.f32 %v4676_v16  ;;  %v1300_v23 = vsub.s32 32, %v1299_v33  ;;  %v1301_v1 = vshll.u32 %v4977_v34, %v1299_v33 }
 0x159   : > { %v1304_v62 = vsub.s32 4294967266, %v1299_v33  ;;  %v1378_v29 = vsel %vm1364_vm9, %v1375_v48, %v1377_v60  ;;  %v5019_v10 = vmul.u32.u64.low %v4988_v35, %v1374_v21  ;;  %v5020_v61 = vmul.u32.u64.high %v4988_v35, %v1374_v21, %v5019_v10 }
 0x15a   : > { %v5015_v37 = vmul.u32.u64.low %v4988_v35, %v1378_v29  ;;  %v5016_v32 = vmul.u32.u64.high %v4988_v35, %v1378_v29, %v5015_v37  ;;  %vm1230_vm10 = vcmp.lt.s32.totalorder %v4738_v57, 0  ;;  %v1302_v26 = vshrl.u32 %v1284_v25, %v1300_v23 }
 0x15b   : > { %v1305_v9 = vadd.s32 127, %v1304_v62  ;;  %v5662_v53 = vand.u32 2147483647, %v5006_v54  ;;  %vm1219_vm6 = vcmp.lt.s32.totalorder %v4971_v56, 2  ;;  %v5729_v34 = vand.u32 2147483647, %v4738_v57 }
 0x15c   : > { %v1314_v46 = vsub.s32 4, %v4958_v51  ;;  %v1437_v7 = vand.u32 2139095040, %v5006_v54  ;;  %vm1220_vm9 = vcmp.eq.s32.totalorder %v4971_v56, 0  ;;  %v1303_v45 = vor.u32 %v1302_v26, %v1301_v1 }
 0x15d   : > { %vm5027_vm12 = vcmp.le.f32.partialorder %v5729_v34, 0.7853982  ;;  %v1306_v36 = vshll.u32 %v1305_v9, 23  ;;  %v1386_v25 = vmul.u32 %v4988_v35, %v1370_v47  ;;  %vm1223_vm14 = vcmp.eq.s32.totalorder %v4971_v56, 2 }
 0x15e   : > { %v5035_v0 = vpop.eup %3568  ;;  %vm1388_vm5 = vc.u32 %v5016_v32, %v5019_v10  ;;  %v1389_v43 = vadd.s32 1, %v5020_v61  ;;  %v1438_v18 = vshrl.u32 %v1437_v7, 23  ;;  %v1310_v33 = vcvt.s32.f32 %v1303_v45 }
 0x15f   : > { %v5040_v48 = vpop.eup %3570  ;;  %v5659_v49 = vxor.u32 2147483648, %v5035_v0  ;;  %v1307_v28 = vor.u32 4788187, %v1306_v36  ;;  %v1441_v21 = vand.u32 8388607, %v5662_v53  ;;  %v1315_v47 = vsel %vm1230_vm10, %v1314_v46, %v4958_v51 }
 0x160   : > { %v5660_v35 = vxor.u32 2147483648, %v5040_v48  ;;  %v1390_v60 = vsel %vm1388_vm5, %v1389_v43, %v5020_v61  ;;  %v3336_v23 = vadd.s32 4294967169, %v1438_v18  ;;  %v5056_v37 = vmul.f32 %v3840_v11, %v171_v27 }
 0x161   : > { %v1225_v1 = vsel %vm1223_vm14, %v5659_v49, %v5040_v48  ;;  %v1308_v62 = vand.u32 2147483647, %v1307_v28  ;;  %v1391_v29 = vadd.s32 %v1390_v60, %v1386_v25  ;;  %v1733_v26 = vadd.s32 3, %v4050_v50 }
 0x162   : > { %v1222_v51 = vsel %vm1220_vm9, %v5035_v0, %v5660_v35  ;;  %v1444_v61 = vadd.s32 1, %v3336_v23  ;;  %v5065_v9 = vadd.s32 3, %v4095_v12  ;;  %v1442_v7 = vor.u32 8388608, %v1441_v21 }
 0x163   : > { %v1226_v34 = vsel %vm1219_vm6, %v1222_v51, %v1225_v1  ;;  %v1311_v46 = vmul.f32 %v1310_v33, %v1308_v62  ;;  %v1392_v8 = vadd.s32 536870912, %v1391_v29  ;;  %v5073_v27 = vsel %vm5027_vm12, 0, %v1315_v47 }
 0x164   : > { %v1227_v11 = vsel %vm5663_vm2, nan, %v1226_v34  ;;  %vm1445_vm9 = vcmp.gt.s32.totalorder %v1444_v61, 0  ;;  %v5661_v45 = vand.u32 2147483647, %v5056_v37  ;;  %v1540_v36 = vand.u32 2139095040, %v5056_v37 }
 0x165   : > { %3105 = vst [vmem:[%s4179_s16 + $0x88] sm:$0xff] %v1227_v11  ;;  %3119 = vst [vmem:[%s4179_s16 + $0x98] sm:$0xff] %v1227_v11  ;;  %v1312_v50 = vxor.u32 2147483648, %v1311_v46  ;;  %v5078_v12 = vshrl.u32 %v1392_v8, 30  ;;  %v1446_v56 = vsel %vm1445_vm9, %v1444_v61, 0  ;;  %v5082_v25 = vand.u32 3, %v5073_v27 }
 0x166   : > { %v1448_v43 = vand.u32 31, %v1446_v56  ;;  %v5084_v18 = vand.u32 3, %v1733_v26  ;;  %v5087_v28 = vadd.s32 3, %v4221_v20  ;;  %v5092_v21 = vadd.s32 %v5019_v10, %v5016_v32 }
 0x167   : > { %v1313_v33 = vsel %vm1230_vm10, %v1312_v50, %v1311_v46  ;;  %v1394_v47 = vshll.u32 %v5078_v12, 30  ;;  %v5095_v60 = vshll.u32 %v1442_v7, 8  ;;  %v5732_v62 = vmov 683565275  }
 0x168   : > { %v1316_v23 = vsel %vm5027_vm12, %v4738_v57, %v1313_v33  ;;  %v1449_v1 = vsub.s32 32, %v1448_v43  ;;  %v1451_v51 = vshll.u32 %v5732_v62, %v1448_v43  ;;  %v5103_v20 = vand.u32 8388607, %v5661_v45 }
 0x169   : > { %3572 = vcosq.f32 %v1316_v23  ;;  %v5105_v61 = vsub.s32 %v1391_v29, %v1394_v47  ;;  %v1447_v32 = vshrl.u32 %v1446_v56, 5  ;;  %v1541_v10 = vshrl.u32 %v1540_v36, 23 }
 0x16a   : > { %3574 = vsinq.f32 %v1316_v23  ;;  %vm1333_vm10 = vcmp.lt.s32.totalorder %v4894_v41, 0  ;;  %v1452_v26 = vshrl.u32 %v5707_v31, %v1449_v1  ;;  %v1454_v2 = vshll.u32 %v5707_v31, %v1448_v43 }
 0x16b   : > { %v1457_v34 = vshll.u32 %v5708_v58, %v1448_v43  ;;  %vm1326_vm6 = vcmp.eq.s32.totalorder %v5082_v25, 2  ;;  %v1397_v46 = vsub.s32 0, %v5105_v61  ;;  %v1450_v8 = vshrl.u32 %v5732_v62, %v1449_v1 }
 0x16c   : > { %v1455_v29 = vshrl.u32 %v5708_v58, %v1449_v1  ;;  %v1458_v7 = vshrl.u32 %v5709_v17, %v1449_v1  ;;  %vm1323_vm12 = vcmp.eq.s32.totalorder %v5082_v25, 0  ;;  %v1453_v11 = vor.u32 %v1452_v26, %v1451_v51 }
 0x16d   : > { %v1460_v50 = vshll.u32 %v5709_v17, %v1448_v43  ;;  %v1461_v56 = vshrl.u32 %v5666_v55, %v1449_v1  ;;  %v1463_v36 = vshll.u32 %v5666_v55, %v1448_v43  ;;  %vm1322_vm14 = vcmp.lt.s32.totalorder %v5082_v25, 2 }
 0x16e   : > { %v3333_v33 = vmin.u32 %v1397_v46, %v5105_v61  ;;  %v1417_v47 = vsub.s32 4, %v5078_v12  ;;  %v3340_v23 = vadd.s32 4294967169, %v1541_v10  ;;  %vm1320_vm5 = vweird.f32 %v4738_v57 }
 0x16f   : > { %v1456_v35 = vor.u32 %v1455_v29, %v1454_v2  ;;  %v1459_v45 = vor.u32 %v1458_v7, %v1457_v34  ;;  %v1462_v51 = vor.u32 %v1461_v56, %v1460_v50  ;;  %v1464_v26 = vshrl.u32 %v5710_v59, %v1449_v1 }
 0x170   : > { %v1399_v53 = vclz %v3333_v33  ;;  %vm1466_vm9 = vcmp.lt.s32.totalorder %v1447_v32, 1  ;;  %vm1467_vm2 = vcmp.lt.s32.totalorder %v1447_v32, 2  ;;  %vm1468_vm4 = vcmp.lt.s32.totalorder %v1447_v32, 3 }
 0x171   : > { %v1465_v43 = vor.u32 %v1464_v26, %v1463_v36  ;;  %vm1469_vm11 = vcmp.lt.s32.totalorder %v1447_v32, 4  ;;  %v1470_v55 = vsel %vm1466_vm9, %v1450_v8, %v1453_v11  ;;  %v1474_v46 = vsel %vm1466_vm9, %v1453_v11, %v1456_v35 }
 0x172   : > { %v5733_v16 = vand.u32 2147483647, %v4894_v41  ;;  %v3334_v49 = vadd.s32 4294967294, %v1399_v53  ;;  %v1471_v2 = vsel %vm1469_vm11, %v1459_v45, 2102212464  ;;  %v1478_v29 = vsel %vm1466_vm9, %v1456_v35, %v1459_v45 }
 0x173   : > { %v1475_v34 = vsel %vm1469_vm11, %v1462_v51, 920167782  ;;  %v1472_v1 = vsel %vm1468_vm4, %v1456_v35, %v1471_v2  ;;  %v1479_v50 = vsel %vm1469_vm11, %v1465_v43, 1326507024  ;;  %v1547_v56 = vadd.s32 1, %v3340_v23  ;;  %v5134_v36 = vpop.eup %3572 }
 0x174   : > { %vm5128_vm8 = vcmp.le.f32.partialorder %v5733_v16, 0.7853982  ;;  %v1476_v7 = vsel %vm1468_vm4, %v1459_v45, %v1475_v34  ;;  %vm3335_vm0 = vcmp.lt.s32.totalorder %v3334_v49, 0  ;;  %v1418_v16 = vsel %vm1333_vm10, %v1417_v47, %v5078_v12  ;;  %v5141_v11 = vpop.eup %3574 }
 0x175   : > { %v1473_v8 = vsel %vm1467_vm2, %v1470_v55, %v1472_v1  ;;  %v1480_v53 = vsel %vm1468_vm4, %v1462_v51, %v1479_v50  ;;  %v5671_v33 = vxor.u32 2147483648, %v5134_v36  ;;  %v1402_v35 = vsel %vm3335_vm0, 0, %v3334_v49 }
 0x176   : > { %v1477_v45 = vsel %vm1467_vm2, %v1474_v46, %v1476_v7  ;;  %v1481_v23 = vsel %vm1467_vm2, %v1478_v29, %v1480_v53  ;;  %v5672_v26 = vxor.u32 2147483648, %v5141_v11  ;;  %v1403_v43 = vsub.s32 32, %v1402_v35 }
 0x177   : > { %v1404_v2 = vshll.u32 %v5105_v61, %v1402_v35  ;;  %v1407_v12 = vsub.s32 4294967266, %v1402_v35  ;;  %v1328_v55 = vsel %vm1326_vm6, %v5671_v33, %v5141_v11  ;;  %vm1548_vm0 = vcmp.gt.s32.totalorder %v1547_v56, 0 }
 0x178   : > { %v5154_v49 = vmul.u32.u64.low %v5095_v60, %v1481_v23  ;;  %v5155_v47 = vmul.u32.u64.high %v5095_v60, %v1481_v23, %v5154_v49  ;;  %v1325_v61 = vsel %vm1323_vm12, %v5134_v36, %v5672_v26  ;;  %v1405_v32 = vshrl.u32 %v5092_v21, %v1403_v43 }
 0x179   : > { %v1408_v51 = vadd.s32 127, %v1407_v12  ;;  %v1549_v46 = vsel %vm1548_vm0, %v1547_v56, 0  ;;  %v1329_v34 = vsel %vm1322_vm14, %v1325_v61, %v1328_v55  ;;  %v5178_v21 = vsel %vm5128_vm8, 0, %v1418_v16 }
 0x17a   : > { %v5166_v29 = vmul.u32.u64.low %v5095_v60, %v1477_v45  ;;  %v5167_v1 = vmul.u32.u64.high %v5095_v60, %v1477_v45, %v5166_v29  ;;  %v5170_v7 = vshrl.u32 %v1549_v46, 5  ;;  %v1330_v50 = vsel %vm1320_vm5, nan, %v1329_v34 }
 0x17b   : > { %v1406_v53 = vor.u32 %v1405_v32, %v1404_v2  ;;  %v1409_v35 = vshll.u32 %v1408_v51, 23  ;;  %v1551_v23 = vand.u32 31, %v1549_v46  ;;  %3106 = vst [vmem:[%s4179_s16 + $0xa0] sm:$0xff] %v1330_v50  ;;  %3120 = vst [vmem:[%s4179_s16 + $0xb0] sm:$0xff] %v1330_v50  ;;  %v1489_v25 = vmul.u32 %v5095_v60, %v1473_v8 }
 0x17c   : > { %vm1491_vm11 = vc.u32 %v5155_v47, %v5166_v29  ;;  %vm1569_vm4 = vcmp.lt.s32.totalorder %v5170_v7, 1  ;;  %v1492_v12 = vadd.s32 1, %v5167_v1  ;;  %vm1736_vm2 = vcmp.eq.s32.totalorder %v5084_v18, 0 }
 0x17d   : > { %v1410_v56 = vor.u32 4788187, %v1409_v35  ;;  %v1413_v45 = vcvt.s32.f32 %v1406_v53  ;;  %v1552_v43 = vsub.s32 32, %v1551_v23  ;;  %v1554_v2 = vshll.u32 %v5732_v62, %v1551_v23 }
 0x17e   : > { %v1557_v55 = vshll.u32 %v5707_v31, %v1551_v23  ;;  %v1560_v49 = vshll.u32 %v5708_v58, %v1551_v23  ;;  %v1563_v16 = vshll.u32 %v5709_v17, %v1551_v23  ;;  %v1493_v51 = vsel %vm1491_vm11, %v1492_v12, %v5167_v1 }
 0x17f   : > { %v1411_v60 = vand.u32 2147483647, %v1410_v56  ;;  %v1553_v8 = vshrl.u32 %v5732_v62, %v1552_v43  ;;  %v1555_v61 = vshrl.u32 %v5707_v31, %v1552_v43  ;;  %v1558_v32 = vshrl.u32 %v5708_v58, %v1552_v43 }
 0x180   : > { %v1561_v46 = vshrl.u32 %v5709_v17, %v1552_v43  ;;  %v5736_v34 = vmov 920167782   ;;  %v1494_v33 = vadd.s32 %v1493_v51, %v1489_v25  ;;  %vm1735_vm6 = vcmp.lt.s32.totalorder %v5084_v18, 2 }
 0x181   : > { %v1564_v50 = vshrl.u32 %v5736_v34, %v1552_v43  ;;  %v1566_v53 = vshll.u32 %v5736_v34, %v1551_v23  ;;  %v1414_v35 = vmul.f32 %v1413_v45, %v1411_v60  ;;  %v1556_v26 = vor.u32 %v1555_v61, %v1554_v2 }
 0x182   : > { %v1559_v57 = vor.u32 %v1558_v32, %v1557_v55  ;;  %v1562_v56 = vor.u32 %v1561_v46, %v1560_v49  ;;  %v1567_v31 = vshrl.u32 %v5710_v59, %v1552_v43  ;;  %vm1571_vm12 = vcmp.lt.s32.totalorder %v5170_v7, 3 }
 0x183   : > { %v1565_v62 = vor.u32 %v1564_v50, %v1563_v16  ;;  %v1415_v58 = vxor.u32 2147483648, %v1414_v35  ;;  %v1495_v1 = vadd.s32 536870912, %v1494_v33  ;;  %vm1570_vm14 = vcmp.lt.s32.totalorder %v5170_v7, 2 }
 0x184   : > { %vm1572_vm9 = vcmp.lt.s32.totalorder %v5170_v7, 4  ;;  %v1568_v17 = vor.u32 %v1567_v31, %v1566_v53  ;;  %v1577_v25 = vsel %vm1569_vm4, %v1556_v26, %v1559_v57  ;;  %v5211_v43 = vand.u32 3, %v5178_v21 }
 0x185   : > { %v1574_v23 = vsel %vm1572_vm9, %v1562_v56, 2102212464  ;;  %v1578_v45 = vsel %vm1572_vm9, %v1565_v62, 920167782  ;;  %v1416_v59 = vsel %vm1333_vm10, %v1415_v58, %v1414_v35  ;;  %v5213_v2 = vshrl.u32 %v1495_v1, 30 }
 0x186   : > { %v1579_v12 = vsel %vm1571_vm12, %v1562_v56, %v1578_v45  ;;  %v1419_v55 = vsel %vm5128_vm8, %v4894_v41, %v1416_v59  ;;  %v1573_v49 = vsel %vm1569_vm4, %v1553_v8, %v1556_v26  ;;  %v1575_v16 = vsel %vm1571_vm12, %v1559_v57, %v1574_v23 }
 0x187   : > { %v1581_v60 = vsel %vm1569_vm4, %v1559_v57, %v1562_v56  ;;  %3576 = vcosq.f32 %v1419_v55  ;;  %v1497_v61 = vshll.u32 %v5213_v2, 30  ;;  %v1580_v32 = vsel %vm1570_vm14, %v1577_v25, %v1579_v12 }
 0x188   : > { %v1582_v51 = vsel %vm1572_vm9, %v1568_v17, 1326507024  ;;  %3578 = vsinq.f32 %v1419_v55  ;;  %v5737_v26 = vor.u32 8388608, %v5103_v20  ;;  %vm1739_vm8 = vcmp.eq.s32.totalorder %v5084_v18, 2 }
 0x189   : > { %v1583_v10 = vsel %vm1571_vm12, %v1565_v62, %v1582_v51  ;;  %v5236_v46 = vsub.s32 %v1494_v33, %v1497_v61  ;;  %v5738_v34 = vxor.u32 2147483648, %v4143_v22  ;;  %v5739_v53 = vxor.u32 2147483648, %v4134_v19 }
 0x18a   : > { %v1585_v8 = vshll.u32 %v5737_v26, 8  ;;  %v1584_v57 = vsel %vm1570_vm14, %v1581_v60, %v1583_v10  ;;  %v1576_v20 = vsel %vm1570_vm14, %v1573_v49, %v1575_v16  ;;  %vm1425_vm10 = vcmp.lt.s32.totalorder %v5211_v43, 2 }
 0x18b   : > { %v1738_v50 = vsel %vm1736_vm2, %v4134_v19, %v5738_v34  ;;  %v1741_v35 = vsel %vm1739_vm8, %v5739_v53, %v4143_v22  ;;  %vm1426_vm0 = vcmp.eq.s32.totalorder %v5211_v43, 0  ;;  %v1500_v33 = vsub.s32 0, %v5236_v46 }
 0x18c   : > { %v5250_v56 = vmul.u32.u64.low %v1585_v8, %v1584_v57  ;;  %v5251_v62 = vmul.u32.u64.high %v1585_v8, %v1584_v57, %v5250_v56  ;;  %v5256_v31 = vmul.u32.u64.low %v1585_v8, %v1580_v32  ;;  %v5257_v58 = vmul.u32.u64.high %v1585_v8, %v1580_v32, %v5256_v31 }
 0x18d   : > { %vm1423_vm11 = vweird.f32 %v4894_v41  ;;  %vm1429_vm4 = vcmp.eq.s32.totalorder %v5211_v43, 2  ;;  %v1742_v19 = vsel %vm1735_vm6, %v1738_v50, %v1741_v35  ;;  %v1838_v22 = vand.u32 3, %v5065_v9 }
 0x18e   : > { %v1942_v7 = vand.u32 3, %v5087_v28  ;;  %v1490_v1 = vadd.s32 %v5166_v29, %v5155_v47  ;;  %v3337_v17 = vmin.u32 %v1500_v33, %v5236_v46  ;;  %v1520_v23 = vsub.s32 4, %v5213_v2 }
 0x18f   : > { %v1592_v25 = vmul.u32 %v1585_v8, %v1576_v20  ;;  %vm1594_vm2 = vc.u32 %v5251_v62, %v5256_v31  ;;  %v1743_v45 = vsel %vm290_vm15, nan, %v1742_v19  ;;  %vm1839_vm12 = vcmp.lt.s32.totalorder %v1838_v22, 2 }
 0x190   : > { %v2045_v18 = vadd.s32 3, %v4361_v42  ;;  %vm1436_vm6 = vcmp.lt.s32.totalorder %v5006_v54, 0  ;;  %v1502_v9 = vclz %v3337_v17  ;;  %v1595_v28 = vadd.s32 1, %v5257_v58  ;;  %3124 = vst [vmem:[%s5279_s17] sm:$0xff] %v1743_v45  ;;  %3138 = vst [vmem:[%s5279_s17 + $0x10] sm:$0xff] %v1743_v45 }
 0x191   : > { %vm1840_vm14 = vcmp.eq.s32.totalorder %v1838_v22, 0  ;;  %vm1843_vm9 = vcmp.eq.s32.totalorder %v1838_v22, 2  ;;  %v5741_v42 = vxor.u32 2147483648, %v4187_v4  ;;  %vm1943_vm15 = vcmp.lt.s32.totalorder %v1942_v7, 2  ;;  %v5289_v59 = vpop.eup %3576 }
 0x192   : > { %v1842_v47 = vsel %vm1840_vm14, %v4187_v4, %v5740_v13  ;;  %vm1944_vm8 = vcmp.eq.s32.totalorder %v1942_v7, 0  ;;  %v3338_v12 = vadd.s32 4294967294, %v1502_v9  ;;  %v1596_v55 = vsel %vm1594_vm2, %v1595_v28, %v5257_v58  ;;  %v5299_v4 = vpop.eup %3578  ;;  %v5763_v13 = vld [vmem:[#allocation25_spill] sm:$0xff] }
 0x193   : > { %v1845_v29 = vsel %vm1843_vm9, %v5741_v42, %v4193_v38  ;;  %v5742_v16 = vxor.u32 2147483648, %v4298_v52  ;;  %v1430_v38 = vxor.u32 2147483648, %v5289_v59  ;;  %v1597_v61 = vadd.s32 %v1596_v55, %v1592_v25 }
 0x194   : > { %v1846_v49 = vsel %vm1839_vm12, %v1842_v47, %v1845_v29  ;;  %vm1947_vm14 = vcmp.eq.s32.totalorder %v1942_v7, 2  ;;  %v1427_v51 = vxor.u32 2147483648, %v5299_v4  ;;  %vm3339_vm9 = vcmp.lt.s32.totalorder %v3338_v12, 0 }
 0x195   : > { %v1946_v60 = vsel %vm1944_vm8, %v4287_v30, %v5742_v16  ;;  %v1847_v32 = vsel %vm393_vm7, nan, %v1846_v49  ;;  %v5743_v10 = vxor.u32 2147483648, %v4287_v30  ;;  %v2046_v8 = vand.u32 3, %v2045_v18 }
 0x196   : > { %3125 = vst [vmem:[%s5279_s17 + $0x8] sm:$0xff] %v1847_v32  ;;  %3139 = vst [vmem:[%s5279_s17 + $0x18] sm:$0xff] %v1847_v32  ;;  %v1431_v57 = vsel %vm1429_vm4, %v1430_v38, %v5299_v4  ;;  %v1505_v14 = vsel %vm3339_vm9, 0, %v3338_v12  ;;  %v1598_v34 = vadd.s32 536870912, %v1597_v61  ;;  %v1428_v30 = vsel %vm1426_vm0, %v5289_v59, %v1427_v51  ;;  %v5750_v32 = vld [vmem:[#allocation21_spill] sm:$0xff] }
 0x197   : > { %v1949_v26 = vsel %vm1947_vm14, %v5743_v10, %v4298_v52  ;;  %v1506_v52 = vsub.s32 32, %v1505_v14  ;;  %v1507_v53 = vshll.u32 %v5236_v46, %v1505_v14  ;;  %v1510_v35 = vsub.s32 4294967266, %v1505_v14 }
 0x198   : > { %v1950_v50 = vsel %vm1943_vm15, %v1946_v60, %v1949_v26  ;;  %v1432_v20 = vsel %vm1425_vm10, %v1428_v30, %v1431_v57  ;;  %v5324_v56 = vshrl.u32 %v1598_v34, 30  ;;  %vm2047_vm7 = vcmp.lt.s32.totalorder %v2046_v8, 2  ;;  %v5751_v26 = vld [vmem:[#allocation26_spill] sm:$0xff] }
 0x199   : > { %v1951_v33 = vsel %vm496_vm1, nan, %v1950_v50  ;;  %v1433_v58 = vsel %vm1423_vm11, nan, %v1432_v20  ;;  %v1508_v19 = vshrl.u32 %v1490_v1, %v1506_v52  ;;  %v1511_v22 = vadd.s32 127, %v1510_v35  ;;  %v5752_v50 = vld [vmem:[#allocation17_spill] sm:$0xff] }
 0x19a   : > { %3126 = vst [vmem:[%s5279_s17 + $0x20] sm:$0xff] %v1951_v33  ;;  %3140 = vst [vmem:[%s5279_s17 + $0x30] sm:$0xff] %v1951_v33  ;;  %vm2048_vm0 = vcmp.eq.s32.totalorder %v2046_v8, 0  ;;  %v1521_v43 = vsel %vm1436_vm6, %v1520_v23, %v5213_v2  ;;  %v1600_v46 = vshll.u32 %v5324_v56, 30  ;;  %vm2051_vm1 = vcmp.eq.s32.totalorder %v2046_v8, 2 }
 0x19b   : > { %3107 = vst [vmem:[%s4179_s16 + $0xa8] sm:$0xff] %v1433_v58  ;;  %3121 = vst [vmem:[%s4179_s16 + $0xb8] sm:$0xff] %v1433_v58  ;;  %v2050_v7 = vsel %vm2048_vm0, %v4404_v3, %v5744_v15  ;;  %v1509_v1 = vor.u32 %v1508_v19, %v1507_v53  ;;  %v1512_v17 = vshll.u32 %v1511_v22, 23  ;;  %v5745_v25 = vxor.u32 2147483648, %v4404_v3  ;;  %v5757_v19 = vld [vmem:[#allocation20_spill] sm:$0xff] }
 0x19c   : > { %v2149_v18 = vadd.s32 3, %v4441_v24  ;;  %v5345_v9 = vsub.s32 %v1597_v61, %v1600_v46  ;;  %v2253_v23 = vadd.s32 3, %v4551_v5  ;;  %v5746_v28 = vand.u32 2147483647, %v5006_v54 }
 0x19d   : > { %v2053_v45 = vsel %vm2051_vm1, %v5745_v25, %v4408_v44  ;;  %v1513_v47 = vor.u32 4788187, %v1512_v17  ;;  %v1516_v42 = vcvt.s32.f32 %v1509_v1  ;;  %v1593_v16 = vadd.s32 %v5256_v31, %v5251_v62  ;;  %v5754_v62 = vld [vmem:[#allocation16_spill] sm:$0xff] }
 0x19e   : > { %v2054_v2 = vsel %vm2047_vm7, %v2050_v7, %v2053_v45  ;;  %vm5351_vm10 = vcmp.le.f32.partialorder %v5746_v28, 0.7853982  ;;  %v1603_v24 = vsub.s32 0, %v5345_v9  ;;  %v2150_v5 = vand.u32 3, %v2149_v18 }
 0x19f   : > { %v2055_v3 = vsel %vm599_vm13, nan, %v2054_v2  ;;  %v5359_v44 = vsel %vm5351_vm10, 0, %v1521_v43  ;;  %v2254_v12 = vand.u32 3, %v2253_v23  ;;  %v1514_v55 = vand.u32 2147483647, %v1513_v47  ;;  %v5759_v43 = vld [vmem:[#allocation19_spill] sm:$0xff] }
 0x1a0   : > { %3127 = vst [vmem:[%s5279_s17 + $0x28] sm:$0xff] %v2055_v3  ;;  %3141 = vst [vmem:[%s5279_s17 + $0x38] sm:$0xff] %v2055_v3  ;;  %v5365_v49 = vand.u32 3, %v5359_v44  ;;  %v1623_v60 = vsub.s32 4, %v5324_v56  ;;  %v3341_v61 = vmin.u32 %v1603_v24, %v5345_v9  ;;  %v2357_v10 = vadd.s32 3, %v5750_v32  ;;  %v5761_v2 = vld [vmem:[#allocation13_spill] sm:$0xff] }
 0x1a1   : > { %v2461_v8 = vadd.s32 3, %v5751_v26  ;;  %v2565_v57 = vadd.s32 3, %v4908_v6  ;;  %v1517_v14 = vmul.f32 %v1516_v42, %v1514_v55  ;;  %vm2151_vm13 = vcmp.lt.s32.totalorder %v2150_v5, 2 }
 0x1a2   : > { %vm2152_vm4 = vcmp.eq.s32.totalorder %v2150_v5, 0  ;;  %vm2155_vm2 = vcmp.eq.s32.totalorder %v2150_v5, 2  ;;  %v1605_v34 = vclz %v3341_v61  ;;  %v5753_v30 = vxor.u32 2147483648, %v5752_v50  ;;  %v5765_v5 = vld [vmem:[#allocation23_spill] sm:$0xff] }
 0x1a3   : > { %v5755_v52 = vxor.u32 2147483648, %v5754_v62  ;;  %vm2255_vm12 = vcmp.lt.s32.totalorder %v2254_v12, 2  ;;  %v1518_v35 = vxor.u32 2147483648, %v1517_v14  ;;  %vm2256_vm15 = vcmp.eq.s32.totalorder %v2254_v12, 0 }
 0x1a4   : > { %v2154_v31 = vsel %vm2152_vm4, %v5754_v62, %v5753_v30  ;;  %vm2259_vm8 = vcmp.eq.s32.totalorder %v2254_v12, 2  ;;  %v3342_v6 = vadd.s32 4294967294, %v1605_v34  ;;  %v5758_v22 = vxor.u32 2147483648, %v5757_v19 }
 0x1a5   : > { %v2157_v53 = vsel %vm2155_vm2, %v5755_v52, %v5752_v50  ;;  %v5760_v15 = vxor.u32 2147483648, %v5759_v43  ;;  %v1519_v1 = vsel %vm1436_vm6, %v1518_v35, %v1517_v14  ;;  %v2358_v25 = vand.u32 3, %v2357_v10  ;;  %v5771_v50 = vld [vmem:[#allocation14_spill] sm:$0xff]  ;;  %v5775_v35 = vld [vmem:[#allocation27_spill] sm:$0xff] }
 0x1a6   : > { %v2158_v20 = vsel %vm2151_vm13, %v2154_v31, %v2157_v53  ;;  %v2258_v46 = vsel %vm2256_vm15, %v5759_v43, %v5758_v22  ;;  %v2462_v45 = vand.u32 3, %v2461_v8  ;;  %v1522_v18 = vsel %vm5351_vm10, %v5006_v54, %v1519_v1  ;;  %v5777_v22 = vld [vmem:[#allocation15_spill] sm:$0xff] }
 0x1a7   : > { %v2159_v58 = vsel %vm702_vm3, nan, %v2158_v20  ;;  %v2261_v7 = vsel %vm2259_vm8, %v5760_v15, %v5757_v19  ;;  %vm1539_vm3 = vcmp.lt.s32.totalorder %v5056_v37, 0  ;;  %vm3343_vm14 = vcmp.lt.s32.totalorder %v3342_v6, 0 }
 0x1a8   : > { %3128 = vst [vmem:[%s5279_s17 + $0x40] sm:$0xff] %v2159_v58  ;;  %3142 = vst [vmem:[%s5279_s17 + $0x50] sm:$0xff] %v2159_v58  ;;  %v2262_v17 = vsel %vm2255_vm12, %v2258_v46, %v2261_v7  ;;  %vm5762_vm9 = vweird.f32 %v5761_v2  ;;  %v2566_v28 = vand.u32 3, %v2565_v57  ;;  %3580 = vcosq.f32 %v1522_v18 }
 0x1a9   : > { %v2263_v23 = vsel %vm5762_vm9, nan, %v2262_v17  ;;  %v1608_v47 = vsel %vm3343_vm14, 0, %v3342_v6  ;;  %vm2359_vm6 = vcmp.lt.s32.totalorder %v2358_v25, 2  ;;  %vm2360_vm7 = vcmp.eq.s32.totalorder %v2358_v25, 0  ;;  %v5776_v6 = vld [vmem:[#allocation28_spill] sm:$0xff] }
 0x1aa   : > { %3129 = vst [vmem:[%s5279_s17 + $0x48] sm:$0xff] %v2263_v23  ;;  %3143 = vst [vmem:[%s5279_s17 + $0x58] sm:$0xff] %v2263_v23  ;;  %3582 = vsinq.f32 %v1522_v18  ;;  %v1609_v42 = vsub.s32 32, %v1608_v47  ;;  %v1610_v29 = vshll.u32 %v5345_v9, %v1608_v47  ;;  %v1613_v3 = vsub.s32 4294967266, %v1608_v47 }
 0x1ab   : > { %vm1532_vm0 = vcmp.eq.s32.totalorder %v5365_v49, 2  ;;  %v5764_v24 = vxor.u32 2147483648, %v5763_v13  ;;  %vm2363_vm1 = vcmp.eq.s32.totalorder %v2358_v25, 2  ;;  %vm2463_vm10 = vcmp.lt.s32.totalorder %v2462_v45, 2  ;;  %v5780_v25 = vld [vmem:[#allocation18_spill] sm:$0xff] }
 0x1ac   : > { %vm2464_vm13 = vcmp.eq.s32.totalorder %v2462_v45, 0  ;;  %vm1529_vm4 = vcmp.eq.s32.totalorder %v5365_v49, 0  ;;  %v1611_v55 = vshrl.u32 %v1593_v16, %v1609_v42  ;;  %v1614_v61 = vadd.s32 127, %v1613_v3 }
 0x1ad   : > { %v2362_v12 = vsel %vm2360_vm7, %v5765_v5, %v5764_v24  ;;  %v5766_v32 = vxor.u32 2147483648, %v5765_v5  ;;  %v5767_v10 = vxor.u32 2147483648, %v4834_v40  ;;  %vm1528_vm2 = vcmp.lt.s32.totalorder %v5365_v49, 2  ;;  %v5784_v24 = vld [vmem:[#allocation22_spill] sm:$0xff] }
 0x1ae   : > { %vm2467_vm12 = vcmp.eq.s32.totalorder %v2462_v45, 2  ;;  %vm2567_vm15 = vcmp.lt.s32.totalorder %v2566_v28, 2  ;;  %vm2568_vm8 = vcmp.eq.s32.totalorder %v2566_v28, 0  ;;  %vm1526_vm14 = vweird.f32 %v5006_v54 }
 0x1af   : > { %v2365_v9 = vsel %vm2363_vm1, %v5766_v32, %v5763_v13  ;;  %v2466_v26 = vsel %vm2464_vm13, %v4830_v63, %v5767_v10  ;;  %v5768_v16 = vand.u32 2147483647, %v5056_v37  ;;  %v1612_v14 = vor.u32 %v1611_v55, %v1610_v29 }
 0x1b0   : > { %v2366_v8 = vsel %vm2359_vm6, %v2362_v12, %v2365_v9  ;;  %v1615_v34 = vshll.u32 %v1614_v61, 23  ;;  %vm5772_vm7 = vweird.f32 %v5771_v50  ;;  %v5773_v62 = vxor.u32 2147483648, %v4830_v63 }
 0x1b1   : > { %vm5417_vm9 = vcmp.le.f32.partialorder %v5768_v16, 0.7853982  ;;  %v2367_v30 = vsel %vm5772_vm7, nan, %v2366_v8  ;;  %v5774_v53 = vxor.u32 2147483648, %v4936_v39  ;;  %vm2571_vm6 = vcmp.eq.s32.totalorder %v2566_v28, 2 }
 0x1b2   : > { %v2469_v31 = vsel %vm2467_vm12, %v5773_v62, %v4834_v40  ;;  %3130 = vst [vmem:[%s5279_s17 + $0x60] sm:$0xff] %v2367_v30  ;;  %3144 = vst [vmem:[%s5279_s17 + $0x70] sm:$0xff] %v2367_v30  ;;  %v2669_v33 = vadd.s32 3, %v5776_v6  ;;  %v1616_v58 = vor.u32 4788187, %v1615_v34  ;;  %v1619_v19 = vcvt.s32.f32 %v1612_v14  ;;  %v3581_v2 = vpop.eup %3580 }
 0x1b3   : > { %v2470_v52 = vsel %vm2463_vm10, %v2466_v26, %v2469_v31  ;;  %v2570_v20 = vsel %vm2568_vm8, %v5775_v35, %v5774_v53  ;;  %vm5778_vm1 = vweird.f32 %v5777_v22  ;;  %v5779_v63 = vxor.u32 2147483648, %v5775_v35 }
 0x1b4   : > { %v2471_v43 = vsel %vm5778_vm1, nan, %v2470_v52  ;;  %v1624_v46 = vsel %vm1539_vm3, %v1623_v60, %v5324_v56  ;;  %v2670_v7 = vand.u32 3, %v2669_v33  ;;  %v2773_v1 = vadd.s32 3, %v5073_v27  ;;  %v3583_v60 = vpop.eup %3582 }
 0x1b5   : > { %v2573_v40 = vsel %vm2571_vm6, %v5779_v63, %v4936_v39  ;;  %3131 = vst [vmem:[%s5279_s17 + $0x68] sm:$0xff] %v2471_v43  ;;  %3145 = vst [vmem:[%s5279_s17 + $0x78] sm:$0xff] %v2471_v43  ;;  %v1617_v17 = vand.u32 2147483647, %v1616_v58  ;;  %vm5781_vm10 = vweird.f32 %v5780_v25  ;;  %v2877_v18 = vadd.s32 3, %v5178_v21 }
 0x1b6   : > { %v2574_v15 = vsel %vm2567_vm15, %v2570_v20, %v2573_v40  ;;  %v2981_v39 = vadd.s32 3, %v5359_v44  ;;  %vm2671_vm13 = vcmp.lt.s32.totalorder %v2670_v7, 2  ;;  %vm2672_vm12 = vcmp.eq.s32.totalorder %v2670_v7, 0 }
 0x1b7   : > { %v2575_v45 = vsel %vm5781_vm10, nan, %v2574_v15  ;;  %vm2675_vm8 = vcmp.eq.s32.totalorder %v2670_v7, 2  ;;  %v2774_v56 = vand.u32 3, %v2773_v1  ;;  %v1533_v23 = vxor.u32 2147483648, %v3581_v2 }
 0x1b8   : > { %3132 = vst [vmem:[%s5279_s17 + $0x80] sm:$0xff] %v2575_v45  ;;  %3146 = vst [vmem:[%s5279_s17 + $0x90] sm:$0xff] %v2575_v45  ;;  %v1620_v27 = vmul.f32 %v1619_v19, %v1617_v17  ;;  %v5782_v28 = vxor.u32 2147483648, %v5040_v48  ;;  %v5783_v21 = vxor.u32 2147483648, %v5035_v0  ;;  %v1530_v42 = vxor.u32 2147483648, %v3583_v60 }
 0x1b9   : > { %vm2775_vm15 = vcmp.lt.s32.totalorder %v2774_v56, 2  ;;  %vm2776_vm7 = vcmp.eq.s32.totalorder %v2774_v56, 0  ;;  %v1534_v3 = vsel %vm1532_vm0, %v1533_v23, %v3583_v60  ;;  %vm5785_vm6 = vweird.f32 %v5784_v24 }
 0x1ba   : > { %v2674_v47 = vsel %vm2672_vm12, %v5035_v0, %v5782_v28  ;;  %v2677_v44 = vsel %vm2675_vm8, %v5783_v21, %v5040_v48  ;;  %v1621_v13 = vxor.u32 2147483648, %v1620_v27  ;;  %v5786_v12 = vxor.u32 2147483648, %v5141_v11 }
 0x1bb   : > { %v2678_v29 = vsel %vm2671_vm13, %v2674_v47, %v2677_v44  ;;  %v1531_v0 = vsel %vm1529_vm4, %v3581_v2, %v1530_v42  ;;  %vm2779_vm1 = vcmp.eq.s32.totalorder %v2774_v56, 2  ;;  %v2878_v48 = vand.u32 3, %v2877_v18 }
 0x1bc   : > { %v2679_v5 = vsel %vm5785_vm6, nan, %v2678_v29  ;;  %v2778_v55 = vsel %vm2776_vm7, %v5134_v36, %v5786_v12  ;;  %v2982_v61 = vand.u32 3, %v2981_v39  ;;  %v1535_v32 = vsel %vm1528_vm2, %v1531_v0, %v1534_v3 }
 0x1bd   : > { %3133 = vst [vmem:[%s5279_s17 + $0x88] sm:$0xff] %v2679_v5  ;;  %3147 = vst [vmem:[%s5279_s17 + $0x98] sm:$0xff] %v2679_v5  ;;  %v1622_v9 = vsel %vm1539_vm3, %v1621_v13, %v1620_v27  ;;  %v1626_v10 = vsel %vm5417_vm9, 0, %v1624_v46  ;;  %v5787_v26 = vxor.u32 2147483648, %v5134_v36  ;;  %v1536_v16 = vsel %vm1526_vm14, nan, %v1535_v32 }
 0x1be   : > { %v1625_v49 = vsel %vm5417_vm9, %v5056_v37, %v1622_v9  ;;  %vm2879_vm0 = vcmp.lt.s32.totalorder %v2878_v48, 2  ;;  %3108 = vst [vmem:[%s4179_s16 + $0xc0] sm:$0xff] %v1536_v16  ;;  %3122 = vst [vmem:[%s4179_s16 + $0xd0] sm:$0xff] %v1536_v16  ;;  %vm2880_vm3 = vcmp.eq.s32.totalorder %v2878_v48, 0  ;;  %vm2883_vm4 = vcmp.eq.s32.totalorder %v2878_v48, 2 }
 0x1bf   : > { %v2781_v8 = vsel %vm2779_vm1, %v5787_v26, %v5141_v11  ;;  %3584 = vcosq.f32 %v1625_v49  ;;  %v2882_v36 = vsel %vm2880_vm3, %v5289_v59, %v1427_v51  ;;  %v2885_v11 = vsel %vm2883_vm4, %v1430_v38, %v5299_v4 }
 0x1c0   : > { %v2782_v14 = vsel %vm2775_vm15, %v2778_v55, %v2781_v8  ;;  %3586 = vsinq.f32 %v1625_v49  ;;  %vm2983_vm2 = vcmp.lt.s32.totalorder %v2982_v61, 2  ;;  %v2886_v57 = vsel %vm2879_vm0, %v2882_v36, %v2885_v11 }
 0x1c1   : > { %v2783_v50 = vsel %vm1320_vm5, nan, %v2782_v14  ;;  %vm2984_vm5 = vcmp.eq.s32.totalorder %v2982_v61, 0  ;;  %vm2987_vm9 = vcmp.eq.s32.totalorder %v2982_v61, 2  ;;  %v3085_v30 = vadd.s32 3, %v1626_v10 }
 0x1c2   : > { %3134 = vst [vmem:[%s5279_s17 + $0xa0] sm:$0xff] %v2783_v50  ;;  %3148 = vst [vmem:[%s5279_s17 + $0xb0] sm:$0xff] %v2783_v50  ;;  %v2887_v62 = vsel %vm1423_vm11, nan, %v2886_v57  ;;  %v2986_v31 = vsel %vm2984_vm5, %v3581_v2, %v1530_v42  ;;  %v2989_v52 = vsel %vm2987_vm9, %v1533_v23, %v3583_v60  ;;  %v1630_v53 = vand.u32 3, %v1626_v10 }
 0x1c3   : > { %3135 = vst [vmem:[%s5279_s17 + $0xa8] sm:$0xff] %v2887_v62  ;;  %3149 = vst [vmem:[%s5279_s17 + $0xb8] sm:$0xff] %v2887_v62  ;;  %v2990_v51 = vsel %vm2983_vm2, %v2986_v31, %v2989_v52  ;;  %v3086_v4 = vand.u32 3, %v3085_v30 }
 0x1c4   : > { %v2991_v59 = vsel %vm1526_vm14, nan, %v2990_v51  ;;  %vm1635_vm10 = vcmp.eq.s32.totalorder %v1630_v53, 2  ;;  %vm1632_vm11 = vcmp.eq.s32.totalorder %v1630_v53, 0  ;;  %vm1631_vm8 = vcmp.lt.s32.totalorder %v1630_v53, 2 }
 0x1c5   : > { %3136 = vst [vmem:[%s5279_s17 + $0xc0] sm:$0xff] %v2991_v59  ;;  %3150 = vst [vmem:[%s5279_s17 + $0xd0] sm:$0xff] %v2991_v59  ;;  %vm3091_vm13 = vcmp.eq.s32.totalorder %v3086_v4, 2  ;;  %vm3088_vm12 = vcmp.eq.s32.totalorder %v3086_v4, 0  ;;  %vm3087_vm15 = vcmp.lt.s32.totalorder %v3086_v4, 2  ;;  %vm1629_vm14 = vweird.f32 %v5056_v37 }
 0x1c9   : > { %v3585_v38 = vpop.eup %3584 }
 0x1ca   : > { %v3587_v41 = vpop.eup %3586  ;;  %v1636_v35 = vxor.u32 2147483648, %v3585_v38 }
 0x1cb   : > { %v1633_v20 = vxor.u32 2147483648, %v3587_v41 }
 0x1cc   : > { %v1637_v54 = vsel %vm1635_vm10, %v1636_v35, %v3587_v41  ;;  %v3093_v6 = vsel %vm3091_vm13, %v1636_v35, %v3587_v41 }
 0x1cd   : > { %v1634_v33 = vsel %vm1632_vm11, %v3585_v38, %v1633_v20  ;;  %v3090_v58 = vsel %vm3088_vm12, %v3585_v38, %v1633_v20 }
 0x1ce   : > { %v1638_v19 = vsel %vm1631_vm8, %v1634_v33, %v1637_v54  ;;  %v3094_v37 = vsel %vm3087_vm15, %v3090_v58, %v3093_v6 }
 0x1cf   : > { %v1639_v22 = vsel %vm1629_vm14, nan, %v1638_v19  ;;  %v3095_v43 = vsel %vm1629_vm14, nan, %v3094_v37 }
 0x1d0   : > { %3109 = vst [vmem:[%s4179_s16 + $0xc8] sm:$0xff] %v1639_v22  ;;  %3123 = vst [vmem:[%s4179_s16 + $0xd8] sm:$0xff] %v1639_v22 }
 0x1d1   : > { %3137 = vst [vmem:[%s5279_s17 + $0xc8] sm:$0xff] %v3095_v43  ;;  %3151 = vst [vmem:[%s5279_s17 + $0xd8] sm:$0xff] %v3095_v43 }
 0x1d2   : > { %3629 = shalt.err (!%p3626_p4)
}
 0x1d3   : > { %s3630_s6 = scalar_lea.hbm %s5512_s25, 3584  ;;  %s3634_s16 = scalar_lea.hbm %s5599_s1, 7168 }
 0x1d4   : > { %p3631_p7 = scmp.ne.s32.totalorder %s5512_s25, %s3630_s6  ;;  %p3635_p13 = scmp.lt.u32.totalorder %s5512_s25, %s5599_s1 }
 0x1d5   : > { %p3636_p1 = scmp.lt.u32.totalorder %s3634_s16, %s3630_s6  ;;  %p3638_p5 = scmp.lt.u32.totalorder %s3630_s6, %s5512_s25 }
 0x1d6   : > { %p3632_p8 = pnand %p3631_p7, %p5789_p6 }
 0x1d7   : > { %p3637_p0 = por %p3636_p1, %p3635_p13 }
 0x1d8   : > { %p3633_p11 = pneg %p3632_p8 }
 0x1d9   : > { %p3639_p9 = por %p3638_p5, %p3637_p0 }
 0x1db   : > { %p3640_p10 = pnand %p3639_p9, %p3633_p11 }
 0x1dd   : > { %3643 = shalt.err (!%p3640_p10)
}
 0x1de   : > { %s3724_s13 = smov 512   ;;  %s3725_s24 = smov 32  }
 0x1df   : > { %3473 = dma.vmem_to_hbm [thread:$0]  (%p5789_p6), %s5514_s22, 3584, %s5512_s25, %s3153_s29, %s3724_s13, %s3724_s13, %s3725_s24  }
 0x1e0   : > { %s3158_s26 = scalar_lea.sflag [#allocation7], %s4111_s8  ;;  %s3644_s27 = scalar_lea.vmem %s5521_s23, 3584 }
 0x1e1   : > { %p3645_p12 = scmp.ne.s32.totalorder %s5521_s23, %s3644_s27  ;;  %s3726_s30 = smov [#allocation6]  }
 0x1e2   : > { %s3648_s3 = sshll.u32 %s3726_s30, 4  ;;  %s3649_s3 = int_to_ptr.vmem [resolvable:$false] %s3648_s3 }
 0x1e3   : > { %p3646_p2 = pnand %p3645_p12, %p5789_p6  ;;  %s3650_s4 = scalar_lea.vmem %s3649_s3, 7168 }
 0x1e4   : > { %p3651_p4 = scmp.lt.s32.totalorder %s5521_s23, %s3649_s3  ;;  %p3652_p7 = scmp.lt.s32.totalorder %s3650_s4, %s3644_s27 }
 0x1e5   : > { %p3647_p3 = pneg %p3646_p2 }
 0x1e6   : > { %p3653_p8 = por %p3652_p7, %p3651_p4 }
 0x1e8   : > { %p3654_p11 = pnand %p3653_p8, %p3647_p3 }
 0x1ea   : > { %3657 = shalt.err (!%p3654_p11)
}
 0x1eb   : > { %s3658_s22 = scalar_lea.hbm %s5519_s28, 3584  ;;  %s3662_s5 = scalar_lea.hbm %s5600_s2, 7168 }
 0x1ec   : > { %p3659_p13 = scmp.ne.s32.totalorder %s5519_s28, %s3658_s22  ;;  %p3663_p5 = scmp.lt.u32.totalorder %s5519_s28, %s5600_s2 }
 0x1ed   : > { %p3664_p9 = scmp.lt.u32.totalorder %s3662_s5, %s3658_s22  ;;  %p3666_p12 = scmp.lt.u32.totalorder %s3658_s22, %s5519_s28 }
 0x1ee   : > { %p3660_p1 = pnand %p3659_p13, %p5789_p6 }
 0x1ef   : > { %p3665_p10 = por %p3664_p9, %p3663_p5 }
 0x1f0   : > { %p3661_p0 = pneg %p3660_p1 }
 0x1f1   : > { %p3667_p2 = por %p3666_p12, %p3665_p10 }
 0x1f3   : > { %p3668_p3 = pnand %p3667_p2, %p3661_p0 }
 0x1f5   : > { %3671 = shalt.err (!%p3668_p3)
}
 0x1f6   : > { %3474 = dma.vmem_to_hbm [thread:$0]  (%p5789_p6), %s5521_s23, 3584, %s5519_s28, %s3158_s26, %s3724_s13, %s3724_s13, %s3725_s24  }
 0x1f7 PF: > { %p3490_p4 = scmp.ge.s32.totalorder %s3714_s12, 2  ;;  %s3204_s14 = sand.u32 1, %s3702_s9  }
 0x1f8   : > { %p5790_p7 = scmp.ne.s32.totalorder %s5675_s20, 0  ;;  %s3205_s16 = scalar_lea.sflag [#allocation4], %s3204_s14 }
 0x1fa   : > { %p3482_p8 = pnand %p3490_p4, %p5790_p7 }
 0x1fc   : > { %3693 = dma.done.wait (!%p3482_p8), %s3205_s16, 3584  }
 0x1fd   : > { %3695 = vsyncadd (!%p3482_p8), %s3205_s16, 4294963712  ;;  %s3214_s19 = scalar_lea.sflag [#allocation7], %s3204_s14 }
 0x1fe   : > { %3697 = dma.done.wait (!%p3482_p8), %s3214_s19, 3584  }
 0x1ff   : > { %3699 = vsyncadd (!%p3482_p8), %s3214_s19, 4294963712  ;;  %p17_p6 = scmp.ge.s32.totalorder %s3767_s15, 4   ;;  %s5791_s9 = smov %s3706_s10 }
 0x200   : > { %s5792_s10 = smov %s3710_s11  ;;  %s5793_s11 = smov %s3778_s18 }
 0x201   : > { %s5794_s12 = smov %s3767_s15  ;;  %19 = sbr.rel (!%p17_p6) target bundleno = 6 (0x6), region = 78 }
 0x208   :  { %3219 = vsyncpa [#allocation3], 1 }
 0x209   :  { %3221 = vsyncpa [#allocation3 + $0x1], 1 }
 0x20a   :  { %3222 = vsyncpa [#allocation4], 1 }
 0x20b   :  { %3224 = vsyncpa [#allocation4 + $0x1], 1 }
 0x20c   :  { %3225 = vsyncpa [#allocation7], 1 }
 0x20d   :  { %3227 = vsyncpa [#allocation7 + $0x1], 1 }

</bundles_post_ra>
